<compile_context>
chip_gen: v7x
topology: tpu7x:2x2x1
jax: 0.10.0
libtpu: 0.0.40
codegen_flags: <defaults>
</compile_context>

<pallas_src>
import functools

import jax
import jax.numpy as jnp
from jax.experimental import pallas as pl
from jax.experimental.pallas import tpu as pltpu


def _simam_se_kernel(lam_ref, w1_ref, w2_ref, x_ref, o_ref, *,
                     wp: int, bw: int, bh: int, inv_n1: float, inv_d: float):
    """One batch element.

    x_ref / o_ref: (Cp, S) with S = Hp*Wp (lane-dense).  Lane l maps to
    (row, col) = (l // Wp, l % Wp); the 2x2 blocks are (row<bh) x (col<bw).
    w1_ref: (Cp, hidden) = fc1.weight.T,  w2_ref: (Cp, hidden) = fc2.weight.
    lam_ref: (1,) f32 dynamic SimAM lambda in SMEM.
    """
    x = x_ref[...].astype(jnp.float32)                        # (Cp, S)
    lam = lam_ref[0]

    S = x.shape[-1]
    lane = jax.lax.broadcasted_iota(jnp.int32, (1, S), 1)
    top = lane < (bh * wp)                                    # rows [0, bh)
    left = (lane % wp) < bw                                   # cols [0, bw)
    tl = jnp.logical_and(top, left)

    def block_sums(v):
        """Per-channel sums over the four blocks: 3 masked + 1 full reduce."""
        s_tl = jnp.sum(jnp.where(tl, v, 0.0), axis=-1, keepdims=True)     # (Cp,1)
        s_t = jnp.sum(jnp.where(top, v, 0.0), axis=-1, keepdims=True)
        s_l = jnp.sum(jnp.where(left, v, 0.0), axis=-1, keepdims=True)
        s_all = jnp.sum(v, axis=-1, keepdims=True)
        s_tr = s_t - s_tl
        s_bl = s_l - s_tl
        s_br = s_all - s_t - s_bl
        return s_tl, s_tr, s_bl, s_br

    def scatter(v_tl, v_tr, v_bl, v_br):
        """Broadcast per-block (Cp,1) scalars back over the (Cp,S) tile."""
        return jnp.where(top, jnp.where(left, v_tl, v_tr),
                         jnp.where(left, v_bl, v_br))

    # ---- SimAM energy + sigmoid gate, independently per 2x2 block -----------
    sx = block_sums(x)
    mu = scatter(*(s * inv_d for s in sx))                    # per-block mean
    d2 = jnp.square(x - mu)
    sd = block_sums(d2)
    eps = jnp.float32(1e-30)   # guards 0/0 (zero-variance blocks / padded channels)
    inv_den = scatter(*(1.0 / jnp.maximum(4.0 * (s * inv_n1 + lam), eps)
                        for s in sd))                          # exact reciprocal
    y = d2 * inv_den + 0.5
    enh = x * jax.nn.sigmoid(y)

    # ---- shared SE block (channel squeeze-excite) per enhanced block --------
    w1t = w1_ref[...].astype(jnp.float32)                     # (Cp, hidden) = fc1.W^T
    w2 = w2_ref[...].astype(jnp.float32)                      # (Cp, hidden) = fc2.W

    def se_gate(pooled):                                      # (Cp,1) -> (Cp,1)
        h = jnp.maximum(jnp.sum(w1t * pooled, axis=0, keepdims=True), 0.0)  # (1,hid)
        acc = jnp.sum(w2 * h, axis=-1, keepdims=True)                        # (Cp,1)
        return jax.nn.sigmoid(acc)

    se = block_sums(enh)
    gate = scatter(*(se_gate(s * inv_d) for s in se))          # avg-pool + fc + sigmoid
    o_ref[...] = (enh * gate).astype(o_ref.dtype)


def dynamic_simam_2x2_slicing(x, w_fc1, w_fc2, *, e_lambda=1e-4, dynamic=True,
                              io_dtype=None):
    """Forward of DynamicSimAMWith2x2Slicing.

    x:     (B, C, H, W)
    w_fc1: (C // 16, C)  SEBlock fc[0].weight (bias-free)
    w_fc2: (C, C // 16)  SEBlock fc[2].weight (bias-free)
    io_dtype: optional reduced-precision activation I/O dtype (e.g. bf16);
              in-kernel compute stays float32.
    """
    B, C, H, W = x.shape
    hidden = w_fc1.shape[0]
    assert w_fc1.shape == (hidden, C) and w_fc2.shape == (C, hidden)
    orig_dtype = x.dtype

    pad_h = (2 - H % 2) % 2
    pad_w = (2 - W % 2) % 2
    Hp, Wp = H + pad_h, W + pad_w
    bh, bw = Hp // 2, Wp // 2
    S = Hp * Wp

    # Dynamic lambda = e_lambda * log1p(|mean of spatially padded x|).  Pads are
    # zeros, so mean = sum(original x) / padded element count: one HBM read of
    # the original tensor, no extra pass over the padded copy.
    if dynamic:
        mean = jnp.sum(x.astype(jnp.float32)) / jnp.float32(B * C * Hp * Wp)
        lam = jnp.float32(e_lambda) * jnp.log1p(jnp.abs(mean))
    else:
        lam = jnp.float32(e_lambda)
    lam = jnp.asarray(lam, jnp.float32).reshape(1)

    if io_dtype is not None:
        x = x.astype(io_dtype)

    # Single jnp.pad: even spatial pad (matches F.pad) + channel pad to a
    # multiple of 8 (sublane tiling).  Zero channels stay zero through SimAM
    # and the SE fc and are sliced off at the end.
    Cp = -(-C // 8) * 8
    if pad_h or pad_w or Cp != C:
        x = jnp.pad(x, ((0, 0), (0, Cp - C), (0, pad_h), (0, pad_w)))

    # SE weights as 2-D (Cp, hidden): no size-1 middle axis (which would pad
    # its (1, hidden) tail to (8, 128) in VMEM).
    w1t = w_fc1.T.astype(jnp.float32)            # (C, hidden) = fc1.weight.T
    w2 = w_fc2.astype(jnp.float32)               # (C, hidden) = fc2.weight
    if Cp != C:
        w1t = jnp.pad(w1t, ((0, Cp - C), (0, 0)))
        w2 = jnp.pad(w2, ((0, Cp - C), (0, 0)))

    # Pure reshape (no host transpose): lane axis = dense Hp*Wp.
    xv = x.reshape(B, Cp, S)

    n_minus_1 = max(bh * bw - 1, 1)   # guard 1x1 blocks (PyTorch would emit inf/nan)

    kernel = functools.partial(
        _simam_se_kernel, wp=Wp, bw=bw, bh=bh,
        inv_n1=1.0 / float(n_minus_1), inv_d=1.0 / float(bh * bw))

    # Generation-aware VMEM budget (v7x: 64 MiB/TC; v5e/v6e: 128 MiB).
    try:
        vmem_cap = int(pltpu.get_tpu_info().vmem_capacity_bytes)
    except Exception:
        vmem_cap = 128 * 1024 * 1024
    tile_io = Cp * S * x.dtype.itemsize
    est = 4 * tile_io + 8 * Cp * S * 4           # double-buffered I/O + f32 temps
    vmem_limit = int(min(int(0.8 * vmem_cap), max(32 * 1024 * 1024, 2 * est)))
    # TODO(synk): for very large C*Hp*Wp (per-step tile approaching the budget,
    # especially on v7x's 64 MiB) add a channel-tiled grid axis with the SE
    # pooling accumulated across channel tiles and the gate applied in a
    # finalize pass; that also gives the v7x 2-TC megacore more parallel steps.

    out = pl.pallas_call(
        kernel,
        out_shape=jax.ShapeDtypeStruct((B, Cp, S), x.dtype),
        grid_spec=pltpu.PrefetchScalarGridSpec(
            num_scalar_prefetch=0,
            grid=(B,),
            in_specs=[
                pl.BlockSpec(memory_space=pltpu.MemorySpace.SMEM),      # lambda
                pl.BlockSpec((Cp, hidden), lambda b: (0, 0)),           # fc1.W^T
                pl.BlockSpec((Cp, hidden), lambda b: (0, 0)),           # fc2.W
                pl.BlockSpec((None, Cp, S), lambda b: (b, 0, 0)),       # activations
            ],
            out_specs=pl.BlockSpec((None, Cp, S), lambda b: (b, 0, 0)),
        ),
        compiler_params=pltpu.CompilerParams(
            dimension_semantics=("parallel",),
            vmem_limit_bytes=vmem_limit,
        ),
    )(lam, w1t, w2, xv)

    out = out.reshape(B, Cp, Hp, Wp)[:, :C, :H, :W]
    if io_dtype is not None and out.dtype != orig_dtype:
        out = out.astype(orig_dtype)
    return out


def _reference(x, w_fc1, w_fc2, e_lambda=1e-4, dynamic=True):
    """Pure-JAX mirror of the PyTorch forward (for validation)."""
    B, C, H, W = x.shape
    pad_h = (2 - H % 2) % 2
    pad_w = (2 - W % 2) % 2
    if pad_h or pad_w:
        x = jnp.pad(x, ((0, 0), (0, 0), (0, pad_h), (0, pad_w)))
    Hp, Wp = x.shape[2], x.shape[3]
    bh, bw = Hp // 2, Wp // 2
    lam = e_lambda * jnp.log1p(jnp.abs(jnp.mean(x))) if dynamic else e_lambda
    n = max(bh * bw - 1, 1)
    rows = []
    for i in range(2):
        cols = []
        for j in range(2):
            blk = x[:, :, i * bh:(i + 1) * bh, j * bw:(j + 1) * bw]
            mu = blk.mean(axis=(2, 3), keepdims=True)
            d2 = (blk - mu) ** 2
            y = d2 / (4.0 * (d2.sum(axis=(2, 3), keepdims=True) / n + lam)) + 0.5
            enh = blk * jax.nn.sigmoid(y)
            pooled = enh.mean(axis=(2, 3))                    # (B, C)
            hid = jnp.maximum(pooled @ w_fc1.T, 0.0)          # (B, hidden)
            gate = jax.nn.sigmoid(hid @ w_fc2.T)              # (B, C)
            cols.append(enh * gate[:, :, None, None])
        rows.append(jnp.concatenate(cols, axis=3))
    out = jnp.concatenate(rows, axis=2)
    if pad_h or pad_w:
        out = out[:, :, :H, :W]
    return out


if __name__ == "__main__":
    key = jax.random.PRNGKey(0)
    k_x, k_x2, k_w1, k_w2 = jax.random.split(key, 4)

    B, C, H, W = 2, 32, 16, 16            # C=32 -> SE hidden = C // 16 = 2
    hidden = C // 16
    x = jax.random.normal(k_x, (B, C, H, W), dtype=jnp.float32)
    w_fc1 = 0.3 * jax.random.normal(k_w1, (hidden, C), dtype=jnp.float32)
    w_fc2 = 0.3 * jax.random.normal(k_w2, (C, hidden), dtype=jnp.float32)

    out = jax.block_until_ready(dynamic_simam_2x2_slicing(x, w_fc1, w_fc2))
    ref = _reference(x, w_fc1, w_fc2)
    assert out.shape == (B, C, H, W)
    err = float(jnp.max(jnp.abs(out - ref)))
    assert err < 1e-3, f"max abs err {err}"

    # Odd spatial dims exercise the zero-padding path (15x17 -> 16x18).
    x2 = jax.random.normal(k_x2, (1, C, 15, 17), dtype=jnp.float32)
    out2 = jax.block_until_ready(dynamic_simam_2x2_slicing(x2, w_fc1, w_fc2))
    ref2 = _reference(x2, w_fc1, w_fc2)
    assert out2.shape == (1, C, 15, 17)
    err2 = float(jnp.max(jnp.abs(out2 - ref2)))
    assert err2 < 1e-3, f"max abs err {err2}"

    # Optional bf16 activation-I/O path (kernel is HBM-bound -> ~2x bytes saved);
    # in-kernel compute stays f32, so only I/O rounding differs.
    out_bf16 = jax.block_until_ready(
        dynamic_simam_2x2_slicing(x, w_fc1, w_fc2, io_dtype=jnp.bfloat16))
    err3 = float(jnp.max(jnp.abs(out_bf16.astype(jnp.float32) - ref)))
    assert err3 < 1e-1, f"bf16 path max abs err {err3}"

    print("KERNEL_OK")
</pallas_src>

<mosaic_0001>
module attributes {stable_mosaic.version = 11 : i64} {
  func.func @_simam_se_kernel(%arg0: i32, %arg1: memref<1xf32, #tpu.memory_space<smem>>, %arg2: memref<32x2xf32, #tpu.memory_space<vmem>>, %arg3: memref<32x2xf32, #tpu.memory_space<vmem>>, %arg4: memref<1x32x256xf32, #tpu.memory_space<vmem>>, %arg5: memref<1x32x256xf32, #tpu.memory_space<vmem>>) attributes {dimension_semantics = [#tpu.dimension_semantics<parallel>], iteration_bounds = array<i64: 2>, scalar_prefetch = 0 : i64, scratch_operands = 0 : i64, tpu.core_type = #tpu.core_type<tc>, window_params = [{transform_indices = @transform_0, window_bounds = array<i64: 1>}, {pipeline_mode = #tpu.pipeline_mode<synchronous>, transform_indices = @transform_1, window_bounds = array<i64: 32, 2>}, {pipeline_mode = #tpu.pipeline_mode<synchronous>, transform_indices = @transform_2, window_bounds = array<i64: 32, 2>}, {transform_indices = @transform_3, window_bounds = array<i64: 1, 32, 256>}, {transform_indices = @transform_4, window_bounds = array<i64: 1, 32, 256>}]} {
    %c0 = arith.constant 0 : index
    %c0_0 = arith.constant 0 : index
    %c0_1 = arith.constant 0 : index
    %0 = vector.load %arg4[%c0, %c0_0, %c0_1] : memref<1x32x256xf32, #tpu.memory_space<vmem>>, vector<1x32x256xf32>
    %1 = vector.shape_cast %0 : vector<1x32x256xf32> to vector<32x256xf32>
    %c0_2 = arith.constant 0 : index
    %2 = memref.load %arg1[%c0_2] : memref<1xf32, #tpu.memory_space<smem>>
    %3 = tpu.iota {dimensions = array<i32: 1>} : vector<1x256xi32>
    %c128_i32 = arith.constant 128 : i32
    %4 = vector.broadcast %c128_i32 : i32 to vector<1x256xi32>
    %5 = arith.cmpi slt, %3, %4 : vector<1x256xi32>
    %c16_i32 = arith.constant 16 : i32
    %c0_i32 = arith.constant 0 : i32
    %6 = arith.cmpi eq, %c16_i32, %c0_i32 : i32
    %c1_i32 = arith.constant 1 : i32
    %7 = arith.select %6, %c1_i32, %c16_i32 : i32
    %8 = vector.broadcast %7 : i32 to vector<1x256xi32>
    %9 = arith.remsi %3, %8 : vector<1x256xi32>
    %c0_i32_3 = arith.constant 0 : i32
    %10 = vector.broadcast %c0_i32_3 : i32 to vector<1x256xi32>
    %11 = arith.cmpi ne, %9, %10 : vector<1x256xi32>
    %c0_i32_4 = arith.constant 0 : i32
    %12 = vector.broadcast %c0_i32_4 : i32 to vector<1x256xi32>
    %13 = arith.cmpi slt, %9, %12 : vector<1x256xi32>
    %c0_i32_5 = arith.constant 0 : i32
    %14 = arith.cmpi slt, %7, %c0_i32_5 : i32
    %15 = vector.broadcast %14 : i1 to vector<1x256xi1>
    %16 = vector.broadcast %15 : vector<1x256xi1> to vector<1x256xi1>
    %17 = arith.xori %13, %16 : vector<1x256xi1>
    %18 = arith.andi %17, %11 : vector<1x256xi1>
    %19 = vector.broadcast %7 : i32 to vector<1x256xi32>
    %20 = arith.addi %9, %19 : vector<1x256xi32>
    %21 = arith.select %18, %20, %9 : vector<1x256xi1>, vector<1x256xi32>
    %c8_i32 = arith.constant 8 : i32
    %22 = vector.broadcast %c8_i32 : i32 to vector<1x256xi32>
    %23 = arith.cmpi slt, %21, %22 : vector<1x256xi32>
    %24 = arith.andi %5, %23 : vector<1x256xi1>
    %cst = arith.constant 0.000000e+00 : f32
    %25 = vector.shape_cast %24 : vector<1x256xi1> to vector<1x256xi1>
    %26 = vector.broadcast %25 : vector<1x256xi1> to vector<32x256xi1>
    %27 = vector.broadcast %cst : f32 to vector<32x256xf32>
    %28 = arith.select %26, %1, %27 : vector<32x256xi1>, vector<32x256xf32>
    %cst_6 = arith.constant dense<0.000000e+00> : vector<32xf32>
    %29 = vector.multi_reduction <add>, %28, %cst_6 [1] : vector<32x256xf32> to vector<32xf32>
    %30 = vector.shape_cast %29 : vector<32xf32> to vector<32x1xf32>
    %cst_7 = arith.constant 0.000000e+00 : f32
    %31 = vector.shape_cast %5 : vector<1x256xi1> to vector<1x256xi1>
    %32 = vector.broadcast %31 : vector<1x256xi1> to vector<32x256xi1>
    %33 = vector.broadcast %cst_7 : f32 to vector<32x256xf32>
    %34 = arith.select %32, %1, %33 : vector<32x256xi1>, vector<32x256xf32>
    %cst_8 = arith.constant dense<0.000000e+00> : vector<32xf32>
    %35 = vector.multi_reduction <add>, %34, %cst_8 [1] : vector<32x256xf32> to vector<32xf32>
    %36 = vector.shape_cast %35 : vector<32xf32> to vector<32x1xf32>
    %cst_9 = arith.constant 0.000000e+00 : f32
    %37 = vector.shape_cast %23 : vector<1x256xi1> to vector<1x256xi1>
    %38 = vector.broadcast %37 : vector<1x256xi1> to vector<32x256xi1>
    %39 = vector.broadcast %cst_9 : f32 to vector<32x256xf32>
    %40 = arith.select %38, %1, %39 : vector<32x256xi1>, vector<32x256xf32>
    %cst_10 = arith.constant dense<0.000000e+00> : vector<32xf32>
    %41 = vector.multi_reduction <add>, %40, %cst_10 [1] : vector<32x256xf32> to vector<32xf32>
    %42 = vector.shape_cast %41 : vector<32xf32> to vector<32x1xf32>
    %cst_11 = arith.constant dense<0.000000e+00> : vector<32xf32>
    %43 = vector.multi_reduction <add>, %1, %cst_11 [1] : vector<32x256xf32> to vector<32xf32>
    %44 = vector.shape_cast %43 : vector<32xf32> to vector<32x1xf32>
    %45 = arith.subf %36, %30 : vector<32x1xf32>
    %46 = arith.subf %42, %30 : vector<32x1xf32>
    %47 = arith.subf %44, %36 : vector<32x1xf32>
    %48 = arith.subf %47, %46 : vector<32x1xf32>
    %cst_12 = arith.constant 1.562500e-02 : f32
    %49 = vector.broadcast %cst_12 : f32 to vector<32x1xf32>
    %50 = arith.mulf %30, %49 : vector<32x1xf32>
    %cst_13 = arith.constant 1.562500e-02 : f32
    %51 = vector.broadcast %cst_13 : f32 to vector<32x1xf32>
    %52 = arith.mulf %45, %51 : vector<32x1xf32>
    %cst_14 = arith.constant 1.562500e-02 : f32
    %53 = vector.broadcast %cst_14 : f32 to vector<32x1xf32>
    %54 = arith.mulf %46, %53 : vector<32x1xf32>
    %cst_15 = arith.constant 1.562500e-02 : f32
    %55 = vector.broadcast %cst_15 : f32 to vector<32x1xf32>
    %56 = arith.mulf %48, %55 : vector<32x1xf32>
    %57 = vector.shape_cast %23 : vector<1x256xi1> to vector<1x256xi1>
    %58 = vector.broadcast %57 : vector<1x256xi1> to vector<32x256xi1>
    %59 = vector.shape_cast %50 : vector<32x1xf32> to vector<32x1xf32>
    %60 = vector.broadcast %59 : vector<32x1xf32> to vector<32x256xf32>
    %61 = vector.shape_cast %52 : vector<32x1xf32> to vector<32x1xf32>
    %62 = vector.broadcast %61 : vector<32x1xf32> to vector<32x256xf32>
    %63 = arith.select %58, %60, %62 : vector<32x256xi1>, vector<32x256xf32>
    %64 = vector.shape_cast %23 : vector<1x256xi1> to vector<1x256xi1>
    %65 = vector.broadcast %64 : vector<1x256xi1> to vector<32x256xi1>
    %66 = vector.shape_cast %54 : vector<32x1xf32> to vector<32x1xf32>
    %67 = vector.broadcast %66 : vector<32x1xf32> to vector<32x256xf32>
    %68 = vector.shape_cast %56 : vector<32x1xf32> to vector<32x1xf32>
    %69 = vector.broadcast %68 : vector<32x1xf32> to vector<32x256xf32>
    %70 = arith.select %65, %67, %69 : vector<32x256xi1>, vector<32x256xf32>
    %71 = vector.shape_cast %5 : vector<1x256xi1> to vector<1x256xi1>
    %72 = vector.broadcast %71 : vector<1x256xi1> to vector<32x256xi1>
    %73 = arith.select %72, %63, %70 : vector<32x256xi1>, vector<32x256xf32>
    %74 = arith.subf %1, %73 : vector<32x256xf32>
    %75 = arith.mulf %74, %74 : vector<32x256xf32>
    %cst_16 = arith.constant 0.000000e+00 : f32
    %76 = vector.shape_cast %24 : vector<1x256xi1> to vector<1x256xi1>
    %77 = vector.broadcast %76 : vector<1x256xi1> to vector<32x256xi1>
    %78 = vector.broadcast %cst_16 : f32 to vector<32x256xf32>
    %79 = arith.select %77, %75, %78 : vector<32x256xi1>, vector<32x256xf32>
    %cst_17 = arith.constant dense<0.000000e+00> : vector<32xf32>
    %80 = vector.multi_reduction <add>, %79, %cst_17 [1] : vector<32x256xf32> to vector<32xf32>
    %81 = vector.shape_cast %80 : vector<32xf32> to vector<32x1xf32>
    %cst_18 = arith.constant 0.000000e+00 : f32
    %82 = vector.shape_cast %5 : vector<1x256xi1> to vector<1x256xi1>
    %83 = vector.broadcast %82 : vector<1x256xi1> to vector<32x256xi1>
    %84 = vector.broadcast %cst_18 : f32 to vector<32x256xf32>
    %85 = arith.select %83, %75, %84 : vector<32x256xi1>, vector<32x256xf32>
    %cst_19 = arith.constant dense<0.000000e+00> : vector<32xf32>
    %86 = vector.multi_reduction <add>, %85, %cst_19 [1] : vector<32x256xf32> to vector<32xf32>
    %87 = vector.shape_cast %86 : vector<32xf32> to vector<32x1xf32>
    %cst_20 = arith.constant 0.000000e+00 : f32
    %88 = vector.shape_cast %23 : vector<1x256xi1> to vector<1x256xi1>
    %89 = vector.broadcast %88 : vector<1x256xi1> to vector<32x256xi1>
    %90 = vector.broadcast %cst_20 : f32 to vector<32x256xf32>
    %91 = arith.select %89, %75, %90 : vector<32x256xi1>, vector<32x256xf32>
    %cst_21 = arith.constant dense<0.000000e+00> : vector<32xf32>
    %92 = vector.multi_reduction <add>, %91, %cst_21 [1] : vector<32x256xf32> to vector<32xf32>
    %93 = vector.shape_cast %92 : vector<32xf32> to vector<32x1xf32>
    %cst_22 = arith.constant dense<0.000000e+00> : vector<32xf32>
    %94 = vector.multi_reduction <add>, %75, %cst_22 [1] : vector<32x256xf32> to vector<32xf32>
    %95 = vector.shape_cast %94 : vector<32xf32> to vector<32x1xf32>
    %96 = arith.subf %87, %81 : vector<32x1xf32>
    %97 = arith.subf %93, %81 : vector<32x1xf32>
    %98 = arith.subf %95, %87 : vector<32x1xf32>
    %99 = arith.subf %98, %97 : vector<32x1xf32>
    %cst_23 = arith.constant 0.0158730168 : f32
    %100 = vector.broadcast %cst_23 : f32 to vector<32x1xf32>
    %101 = arith.mulf %81, %100 : vector<32x1xf32>
    %102 = vector.broadcast %2 : f32 to vector<32x1xf32>
    %103 = arith.addf %101, %102 : vector<32x1xf32>
    %cst_24 = arith.constant 4.000000e+00 : f32
    %104 = vector.broadcast %cst_24 : f32 to vector<32x1xf32>
    %105 = arith.mulf %104, %103 : vector<32x1xf32>
    %cst_25 = arith.constant 1.000000e-30 : f32
    %106 = vector.broadcast %cst_25 : f32 to vector<32x1xf32>
    %107 = arith.maximumf %105, %106 : vector<32x1xf32>
    %cst_26 = arith.constant 1.000000e+00 : f32
    %108 = vector.broadcast %cst_26 : f32 to vector<32x1xf32>
    %109 = arith.divf %108, %107 : vector<32x1xf32>
    %cst_27 = arith.constant 0.0158730168 : f32
    %110 = vector.broadcast %cst_27 : f32 to vector<32x1xf32>
    %111 = arith.mulf %96, %110 : vector<32x1xf32>
    %112 = vector.broadcast %2 : f32 to vector<32x1xf32>
    %113 = arith.addf %111, %112 : vector<32x1xf32>
    %cst_28 = arith.constant 4.000000e+00 : f32
    %114 = vector.broadcast %cst_28 : f32 to vector<32x1xf32>
    %115 = arith.mulf %114, %113 : vector<32x1xf32>
    %cst_29 = arith.constant 1.000000e-30 : f32
    %116 = vector.broadcast %cst_29 : f32 to vector<32x1xf32>
    %117 = arith.maximumf %115, %116 : vector<32x1xf32>
    %cst_30 = arith.constant 1.000000e+00 : f32
    %118 = vector.broadcast %cst_30 : f32 to vector<32x1xf32>
    %119 = arith.divf %118, %117 : vector<32x1xf32>
    %cst_31 = arith.constant 0.0158730168 : f32
    %120 = vector.broadcast %cst_31 : f32 to vector<32x1xf32>
    %121 = arith.mulf %97, %120 : vector<32x1xf32>
    %122 = vector.broadcast %2 : f32 to vector<32x1xf32>
    %123 = arith.addf %121, %122 : vector<32x1xf32>
    %cst_32 = arith.constant 4.000000e+00 : f32
    %124 = vector.broadcast %cst_32 : f32 to vector<32x1xf32>
    %125 = arith.mulf %124, %123 : vector<32x1xf32>
    %cst_33 = arith.constant 1.000000e-30 : f32
    %126 = vector.broadcast %cst_33 : f32 to vector<32x1xf32>
    %127 = arith.maximumf %125, %126 : vector<32x1xf32>
    %cst_34 = arith.constant 1.000000e+00 : f32
    %128 = vector.broadcast %cst_34 : f32 to vector<32x1xf32>
    %129 = arith.divf %128, %127 : vector<32x1xf32>
    %cst_35 = arith.constant 0.0158730168 : f32
    %130 = vector.broadcast %cst_35 : f32 to vector<32x1xf32>
    %131 = arith.mulf %99, %130 : vector<32x1xf32>
    %132 = vector.broadcast %2 : f32 to vector<32x1xf32>
    %133 = arith.addf %131, %132 : vector<32x1xf32>
    %cst_36 = arith.constant 4.000000e+00 : f32
    %134 = vector.broadcast %cst_36 : f32 to vector<32x1xf32>
    %135 = arith.mulf %134, %133 : vector<32x1xf32>
    %cst_37 = arith.constant 1.000000e-30 : f32
    %136 = vector.broadcast %cst_37 : f32 to vector<32x1xf32>
    %137 = arith.maximumf %135, %136 : vector<32x1xf32>
    %cst_38 = arith.constant 1.000000e+00 : f32
    %138 = vector.broadcast %cst_38 : f32 to vector<32x1xf32>
    %139 = arith.divf %138, %137 : vector<32x1xf32>
    %140 = vector.shape_cast %23 : vector<1x256xi1> to vector<1x256xi1>
    %141 = vector.broadcast %140 : vector<1x256xi1> to vector<32x256xi1>
    %142 = vector.shape_cast %109 : vector<32x1xf32> to vector<32x1xf32>
    %143 = vector.broadcast %142 : vector<32x1xf32> to vector<32x256xf32>
    %144 = vector.shape_cast %119 : vector<32x1xf32> to vector<32x1xf32>
    %145 = vector.broadcast %144 : vector<32x1xf32> to vector<32x256xf32>
    %146 = arith.select %141, %143, %145 : vector<32x256xi1>, vector<32x256xf32>
    %147 = vector.shape_cast %23 : vector<1x256xi1> to vector<1x256xi1>
    %148 = vector.broadcast %147 : vector<1x256xi1> to vector<32x256xi1>
    %149 = vector.shape_cast %129 : vector<32x1xf32> to vector<32x1xf32>
    %150 = vector.broadcast %149 : vector<32x1xf32> to vector<32x256xf32>
    %151 = vector.shape_cast %139 : vector<32x1xf32> to vector<32x1xf32>
    %152 = vector.broadcast %151 : vector<32x1xf32> to vector<32x256xf32>
    %153 = arith.select %148, %150, %152 : vector<32x256xi1>, vector<32x256xf32>
    %154 = vector.shape_cast %5 : vector<1x256xi1> to vector<1x256xi1>
    %155 = vector.broadcast %154 : vector<1x256xi1> to vector<32x256xi1>
    %156 = arith.select %155, %146, %153 : vector<32x256xi1>, vector<32x256xf32>
    %157 = arith.mulf %75, %156 : vector<32x256xf32>
    %cst_39 = arith.constant 5.000000e-01 : f32
    %158 = vector.broadcast %cst_39 : f32 to vector<32x256xf32>
    %159 = arith.addf %157, %158 : vector<32x256xf32>
    %160 = arith.negf %159 : vector<32x256xf32>
    %161 = math.exp %160 : vector<32x256xf32>
    %cst_40 = arith.constant 1.000000e+00 : f32
    %162 = vector.broadcast %cst_40 : f32 to vector<32x256xf32>
    %163 = arith.addf %162, %161 : vector<32x256xf32>
    %164 = arith.divf %162, %163 : vector<32x256xf32>
    %165 = arith.mulf %1, %164 : vector<32x256xf32>
    %c0_41 = arith.constant 0 : index
    %c0_42 = arith.constant 0 : index
    %166 = vector.load %arg2[%c0_41, %c0_42] : memref<32x2xf32, #tpu.memory_space<vmem>>, vector<32x2xf32>
    %c0_43 = arith.constant 0 : index
    %c0_44 = arith.constant 0 : index
    %167 = vector.load %arg3[%c0_43, %c0_44] : memref<32x2xf32, #tpu.memory_space<vmem>>, vector<32x2xf32>
    %cst_45 = arith.constant 0.000000e+00 : f32
    %168 = vector.shape_cast %24 : vector<1x256xi1> to vector<1x256xi1>
    %169 = vector.broadcast %168 : vector<1x256xi1> to vector<32x256xi1>
    %170 = vector.broadcast %cst_45 : f32 to vector<32x256xf32>
    %171 = arith.select %169, %165, %170 : vector<32x256xi1>, vector<32x256xf32>
    %cst_46 = arith.constant dense<0.000000e+00> : vector<32xf32>
    %172 = vector.multi_reduction <add>, %171, %cst_46 [1] : vector<32x256xf32> to vector<32xf32>
    %173 = vector.shape_cast %172 : vector<32xf32> to vector<32x1xf32>
    %cst_47 = arith.constant 0.000000e+00 : f32
    %174 = vector.shape_cast %5 : vector<1x256xi1> to vector<1x256xi1>
    %175 = vector.broadcast %174 : vector<1x256xi1> to vector<32x256xi1>
    %176 = vector.broadcast %cst_47 : f32 to vector<32x256xf32>
    %177 = arith.select %175, %165, %176 : vector<32x256xi1>, vector<32x256xf32>
    %cst_48 = arith.constant dense<0.000000e+00> : vector<32xf32>
    %178 = vector.multi_reduction <add>, %177, %cst_48 [1] : vector<32x256xf32> to vector<32xf32>
    %179 = vector.shape_cast %178 : vector<32xf32> to vector<32x1xf32>
    %cst_49 = arith.constant 0.000000e+00 : f32
    %180 = vector.shape_cast %23 : vector<1x256xi1> to vector<1x256xi1>
    %181 = vector.broadcast %180 : vector<1x256xi1> to vector<32x256xi1>
    %182 = vector.broadcast %cst_49 : f32 to vector<32x256xf32>
    %183 = arith.select %181, %165, %182 : vector<32x256xi1>, vector<32x256xf32>
    %cst_50 = arith.constant dense<0.000000e+00> : vector<32xf32>
    %184 = vector.multi_reduction <add>, %183, %cst_50 [1] : vector<32x256xf32> to vector<32xf32>
    %185 = vector.shape_cast %184 : vector<32xf32> to vector<32x1xf32>
    %cst_51 = arith.constant dense<0.000000e+00> : vector<32xf32>
    %186 = vector.multi_reduction <add>, %165, %cst_51 [1] : vector<32x256xf32> to vector<32xf32>
    %187 = vector.shape_cast %186 : vector<32xf32> to vector<32x1xf32>
    %188 = arith.subf %179, %173 : vector<32x1xf32>
    %189 = arith.subf %185, %173 : vector<32x1xf32>
    %190 = arith.subf %187, %179 : vector<32x1xf32>
    %191 = arith.subf %190, %189 : vector<32x1xf32>
    %cst_52 = arith.constant 1.562500e-02 : f32
    %192 = vector.broadcast %cst_52 : f32 to vector<32x1xf32>
    %193 = arith.mulf %173, %192 : vector<32x1xf32>
    %194 = vector.broadcast %193 : vector<32x1xf32> to vector<32x2xf32>
    %195 = arith.mulf %166, %194 : vector<32x2xf32>
    %cst_53 = arith.constant dense<0.000000e+00> : vector<2xf32>
    %196 = vector.multi_reduction <add>, %195, %cst_53 [0] : vector<32x2xf32> to vector<2xf32>
    %197 = vector.shape_cast %196 : vector<2xf32> to vector<1x2xf32>
    %cst_54 = arith.constant 0.000000e+00 : f32
    %198 = vector.broadcast %cst_54 : f32 to vector<1x2xf32>
    %199 = arith.maximumf %197, %198 : vector<1x2xf32>
    %200 = vector.broadcast %199 : vector<1x2xf32> to vector<32x2xf32>
    %201 = arith.mulf %167, %200 : vector<32x2xf32>
    %cst_55 = arith.constant dense<0.000000e+00> : vector<32xf32>
    %202 = vector.multi_reduction <add>, %201, %cst_55 [1] : vector<32x2xf32> to vector<32xf32>
    %203 = vector.shape_cast %202 : vector<32xf32> to vector<32x1xf32>
    %204 = arith.negf %203 : vector<32x1xf32>
    %205 = math.exp %204 : vector<32x1xf32>
    %cst_56 = arith.constant 1.000000e+00 : f32
    %206 = vector.broadcast %cst_56 : f32 to vector<32x1xf32>
    %207 = arith.addf %206, %205 : vector<32x1xf32>
    %208 = arith.divf %206, %207 : vector<32x1xf32>
    %cst_57 = arith.constant 1.562500e-02 : f32
    %209 = vector.broadcast %cst_57 : f32 to vector<32x1xf32>
    %210 = arith.mulf %188, %209 : vector<32x1xf32>
    %211 = vector.broadcast %210 : vector<32x1xf32> to vector<32x2xf32>
    %212 = arith.mulf %166, %211 : vector<32x2xf32>
    %cst_58 = arith.constant dense<0.000000e+00> : vector<2xf32>
    %213 = vector.multi_reduction <add>, %212, %cst_58 [0] : vector<32x2xf32> to vector<2xf32>
    %214 = vector.shape_cast %213 : vector<2xf32> to vector<1x2xf32>
    %cst_59 = arith.constant 0.000000e+00 : f32
    %215 = vector.broadcast %cst_59 : f32 to vector<1x2xf32>
    %216 = arith.maximumf %214, %215 : vector<1x2xf32>
    %217 = vector.broadcast %216 : vector<1x2xf32> to vector<32x2xf32>
    %218 = arith.mulf %167, %217 : vector<32x2xf32>
    %cst_60 = arith.constant dense<0.000000e+00> : vector<32xf32>
    %219 = vector.multi_reduction <add>, %218, %cst_60 [1] : vector<32x2xf32> to vector<32xf32>
    %220 = vector.shape_cast %219 : vector<32xf32> to vector<32x1xf32>
    %221 = arith.negf %220 : vector<32x1xf32>
    %222 = math.exp %221 : vector<32x1xf32>
    %cst_61 = arith.constant 1.000000e+00 : f32
    %223 = vector.broadcast %cst_61 : f32 to vector<32x1xf32>
    %224 = arith.addf %223, %222 : vector<32x1xf32>
    %225 = arith.divf %223, %224 : vector<32x1xf32>
    %cst_62 = arith.constant 1.562500e-02 : f32
    %226 = vector.broadcast %cst_62 : f32 to vector<32x1xf32>
    %227 = arith.mulf %189, %226 : vector<32x1xf32>
    %228 = vector.broadcast %227 : vector<32x1xf32> to vector<32x2xf32>
    %229 = arith.mulf %166, %228 : vector<32x2xf32>
    %cst_63 = arith.constant dense<0.000000e+00> : vector<2xf32>
    %230 = vector.multi_reduction <add>, %229, %cst_63 [0] : vector<32x2xf32> to vector<2xf32>
    %231 = vector.shape_cast %230 : vector<2xf32> to vector<1x2xf32>
    %cst_64 = arith.constant 0.000000e+00 : f32
    %232 = vector.broadcast %cst_64 : f32 to vector<1x2xf32>
    %233 = arith.maximumf %231, %232 : vector<1x2xf32>
    %234 = vector.broadcast %233 : vector<1x2xf32> to vector<32x2xf32>
    %235 = arith.mulf %167, %234 : vector<32x2xf32>
    %cst_65 = arith.constant dense<0.000000e+00> : vector<32xf32>
    %236 = vector.multi_reduction <add>, %235, %cst_65 [1] : vector<32x2xf32> to vector<32xf32>
    %237 = vector.shape_cast %236 : vector<32xf32> to vector<32x1xf32>
    %238 = arith.negf %237 : vector<32x1xf32>
    %239 = math.exp %238 : vector<32x1xf32>
    %cst_66 = arith.constant 1.000000e+00 : f32
    %240 = vector.broadcast %cst_66 : f32 to vector<32x1xf32>
    %241 = arith.addf %240, %239 : vector<32x1xf32>
    %242 = arith.divf %240, %241 : vector<32x1xf32>
    %cst_67 = arith.constant 1.562500e-02 : f32
    %243 = vector.broadcast %cst_67 : f32 to vector<32x1xf32>
    %244 = arith.mulf %191, %243 : vector<32x1xf32>
    %245 = vector.broadcast %244 : vector<32x1xf32> to vector<32x2xf32>
    %246 = arith.mulf %166, %245 : vector<32x2xf32>
    %cst_68 = arith.constant dense<0.000000e+00> : vector<2xf32>
    %247 = vector.multi_reduction <add>, %246, %cst_68 [0] : vector<32x2xf32> to vector<2xf32>
    %248 = vector.shape_cast %247 : vector<2xf32> to vector<1x2xf32>
    %cst_69 = arith.constant 0.000000e+00 : f32
    %249 = vector.broadcast %cst_69 : f32 to vector<1x2xf32>
    %250 = arith.maximumf %248, %249 : vector<1x2xf32>
    %251 = vector.broadcast %250 : vector<1x2xf32> to vector<32x2xf32>
    %252 = arith.mulf %167, %251 : vector<32x2xf32>
    %cst_70 = arith.constant dense<0.000000e+00> : vector<32xf32>
    %253 = vector.multi_reduction <add>, %252, %cst_70 [1] : vector<32x2xf32> to vector<32xf32>
    %254 = vector.shape_cast %253 : vector<32xf32> to vector<32x1xf32>
    %255 = arith.negf %254 : vector<32x1xf32>
    %256 = math.exp %255 : vector<32x1xf32>
    %cst_71 = arith.constant 1.000000e+00 : f32
    %257 = vector.broadcast %cst_71 : f32 to vector<32x1xf32>
    %258 = arith.addf %257, %256 : vector<32x1xf32>
    %259 = arith.divf %257, %258 : vector<32x1xf32>
    %260 = vector.shape_cast %23 : vector<1x256xi1> to vector<1x256xi1>
    %261 = vector.broadcast %260 : vector<1x256xi1> to vector<32x256xi1>
    %262 = vector.shape_cast %208 : vector<32x1xf32> to vector<32x1xf32>
    %263 = vector.broadcast %262 : vector<32x1xf32> to vector<32x256xf32>
    %264 = vector.shape_cast %225 : vector<32x1xf32> to vector<32x1xf32>
    %265 = vector.broadcast %264 : vector<32x1xf32> to vector<32x256xf32>
    %266 = arith.select %261, %263, %265 : vector<32x256xi1>, vector<32x256xf32>
    %267 = vector.shape_cast %23 : vector<1x256xi1> to vector<1x256xi1>
    %268 = vector.broadcast %267 : vector<1x256xi1> to vector<32x256xi1>
    %269 = vector.shape_cast %242 : vector<32x1xf32> to vector<32x1xf32>
    %270 = vector.broadcast %269 : vector<32x1xf32> to vector<32x256xf32>
    %271 = vector.shape_cast %259 : vector<32x1xf32> to vector<32x1xf32>
    %272 = vector.broadcast %271 : vector<32x1xf32> to vector<32x256xf32>
    %273 = arith.select %268, %270, %272 : vector<32x256xi1>, vector<32x256xf32>
    %274 = vector.shape_cast %5 : vector<1x256xi1> to vector<1x256xi1>
    %275 = vector.broadcast %274 : vector<1x256xi1> to vector<32x256xi1>
    %276 = arith.select %275, %266, %273 : vector<32x256xi1>, vector<32x256xf32>
    %277 = arith.mulf %165, %276 : vector<32x256xf32>
    %c0_72 = arith.constant 0 : index
    %c0_73 = arith.constant 0 : index
    %c0_74 = arith.constant 0 : index
    %278 = vector.load %arg5[%c0_72, %c0_73, %c0_74] : memref<1x32x256xf32, #tpu.memory_space<vmem>>, vector<1x32x256xf32>
    %279 = vector.shape_cast %278 : vector<1x32x256xf32> to vector<32x256xf32>
    %280 = vector.shape_cast %277 : vector<32x256xf32> to vector<1x32x256xf32>
    tpu.vector_store %arg5[%c0_72, %c0_73, %c0_74], %280 {strides = array<i32>} : memref<1x32x256xf32, #tpu.memory_space<vmem>>, vector<1x32x256xf32>,
    return
  }
  func.func @transform_0(%arg0: i32) -> i32 {
    %c0_i32 = arith.constant 0 : i32
    %c0_i32_0 = arith.constant 0 : i32
    return %c0_i32 : i32
  }
  func.func @transform_1(%arg0: i32) -> (i32, i32) {
    %c0_i32 = arith.constant 0 : i32
    %c0_i32_0 = arith.constant 0 : i32
    %c0_i32_1 = arith.constant 0 : i32
    return %c0_i32, %c0_i32_0 : i32, i32
  }
  func.func @transform_2(%arg0: i32) -> (i32, i32) {
    %c0_i32 = arith.constant 0 : i32
    %c0_i32_0 = arith.constant 0 : i32
    %c0_i32_1 = arith.constant 0 : i32
    return %c0_i32, %c0_i32_0 : i32, i32
  }
  func.func @transform_3(%arg0: i32) -> (i32, i32, i32) {
    %c0_i32 = arith.constant 0 : i32
    %c0_i32_0 = arith.constant 0 : i32
    %c0_i32_1 = arith.constant 0 : i32
    return %arg0, %c0_i32, %c0_i32_0 : i32, i32, i32
  }
  func.func @transform_4(%arg0: i32) -> (i32, i32, i32) {
    %c0_i32 = arith.constant 0 : i32
    %c0_i32_0 = arith.constant 0 : i32
    %c0_i32_1 = arith.constant 0 : i32
    return %arg0, %c0_i32, %c0_i32_0 : i32, i32, i32
  }
}

</mosaic_0001>

<bundles_post_ra>
// kernel: tpu_custom_call.1
= control target key start
LH: loop header
LB: loop body
LE: loop exit
PB: predicated region body
PF: predicated region fallthrough
CT: control target
= control target key end

     0   :  { %s2076_s0 = inlined_call_operand.<no memory space> [shape: f32[1], index: 0, kind: input, shape index: {}]   ;;  %s2077_s1 = inlined_call_operand.vmem [shape: f32[32,2], index: 1, kind: input, shape index: {}]   ;;  %s2078_s2 = inlined_call_operand.vmem [shape: f32[32,2], index: 2, kind: input, shape index: {}]   ;;  %s2079_s3 = inlined_call_operand.hbm [shape: f32[2,32,256], index: 3, kind: input, shape index: {}]   ;;  %s2080_s4 = inlined_call_operand.hbm [shape: f32[2,32,256], index: 4, kind: output, shape index: {}]  }
   0x1   :  { %9 = sst [smem:[#allocation2]] %s2076_s0 }
   0x2   :  { %10 = vsyncpa [#allocation4], 0 }
   0x3   :  { %12 = vsyncpa [#allocation4 + $0x1], 0 }
   0x4   :  { %13 = vsyncpa [#allocation5], 0 }
   0x5   :  { %15 = vsyncpa [#allocation5 + $0x1], 0  ;;  %s1518_s17 = smov 0   ;;  %s1520_s18 = smov 0  }
   0x6   :  { %s1522_s19 = smov 0   ;;  %s1524_s20 = smov 0  }
   0x7 LB: > { %s1539_s0 = sadd.s32 4294967295, %s1482_s20   ;;  %s1168_s21 = sadd.s32 4294967294, %s1482_s20   ;;  %s1482_s20 = sphi %s1524_s20, %s2097_s20   ;;  %s1478_s19 = sphi %s1522_s19, %s2096_s19   ;;  %s1474_s18 = sphi %s1520_s18, %s2095_s18   ;;  %s1470_s17 = sphi %s1518_s17, %s2094_s17  }
   0x8   : > { %s1543_s22 = sadd.s32 1, %s1482_s20   ;;  %s91_s23 = sadd.s32 1, %s1478_s19 }
   0x9   : > { %s88_s24 = ssub.s32 %s1482_s20, %s1543_s22  ;;  %p98_p0 = scmp.ne.s32.totalorder %s1478_s19, %s1474_s18 }
   0xa   : > { %p89_p1 = scmp.eq.s32.totalorder %s88_s24, 0  ;;  %p99_p2 = scmp.eq.s32.totalorder %s1482_s20, 0 }
   0xb   : > { %p104_p3 = scmp.ne.s32.totalorder %s1474_s18, %s1470_s17  ;;  %p105_p4 = scmp.eq.s32.totalorder %s1539_s0, 0 }
   0xc   : > { %s1555_s25 = scalar_select %p89_p1, %s1478_s19, %s91_s23  }
   0xd   : > { %p1557_p5 = por %p99_p2, %p98_p0  ;;  %p1561_p6 = por %p105_p4, %p104_p3 }
   0xe   : > { %p128_p7 = scmp.eq.s32.totalorder %s1539_s0, 1  ;;  %p134_p8 = scmp.eq.s32.totalorder %s1168_s21, 1 }
   0xf   : > { %p1220_p10 = scmp.lt.s32.totalorder %s1482_s20, 2  ;;  %s163_s30 = sand.u32 1, %s1478_s19  }
  0x10   : > { %p1568_p11 = por %p128_p7, %p98_p0  ;;  %p1572_p12 = por %p134_p8, %p104_p3 }
  0x11   : > { %s1206_s5 = sshll.u32 %s1482_s20, 10  ;;  %s1171_s6 = sshll.u32 %s163_s30, 6 }
  0x12   : > { %s2084_s28 = scalar_select %p1568_p11, 1, 0 }
  0x13   : > { %s2085_s29 = scalar_select %p1572_p12, 1, 0 }
  0x14   : > { %s1581_s9 = scalar_lea.hbm %s2079_s3, %s1206_s5  ;;  %s167_s10 = scalar_lea.vmem [#allocation3], %s1171_s6 }
  0x15   : > { %s174_s11 = sshll.u32 %s167_s10, 4  ;;  %p1585_p13 = pnand %p1220_p10, %p1557_p5  ;;  %s1589_s11 = int_to_ptr.vmem [resolvable:$true] %s174_s11 }
  0x16   : > { %s1591_s13 = scalar_lea.sflag [#allocation4], %s163_s30  ;;  %s1386_s14 = scalar_lea.hbm %s1581_s9, 1024 }
  0x17   : > { %p1387_p0 = scmp.ne.s32.totalorder %s1581_s9, %s1386_s14  ;;  %p1388_p1 = pneg %p1585_p13 }
  0x18   : > { %s1391_s21 = scalar_lea.hbm %s2079_s3, 2048  ;;  %p1392_p4 = scmp.lt.u32.totalorder %s1581_s9, %s2079_s3 }
  0x19   : > { %p1389_p2 = pnand %p1388_p1, %p1387_p0  ;;  %p1393_p5 = scmp.lt.u32.totalorder %s1391_s21, %s1386_s14 }
  0x1a   : > { %p1395_p8 = scmp.lt.u32.totalorder %s1386_s14, %s1581_s9 }
  0x1b   : > { %p1390_p3 = pneg %p1389_p2  ;;  %p1394_p7 = por %p1393_p5, %p1392_p4 }
  0x1d   : > { %p1396_p10 = por %p1395_p8, %p1394_p7 }
  0x1f   : > { %p1397_p9 = pnand %p1396_p10, %p1390_p3 }
  0x21   : > { %1400 = shalt.err (!%p1397_p9)
}
  0x22   : > { %s1401_s26 = scalar_lea.vmem %s1589_s11, 1024  ;;  %s1484_s30 = smov [#allocation3]  }
  0x23   : > { %p1402_p0 = scmp.ne.s32.totalorder %s1589_s11, %s1401_s26  ;;  %s1406_s5 = sshll.u32 %s1484_s30, 4  ;;  %s1407_s5 = int_to_ptr.vmem [resolvable:$false] %s1406_s5 }
  0x24   : > { %s1408_s6 = scalar_lea.vmem %s1407_s5, 2048  ;;  %p1409_p11 = scmp.lt.s32.totalorder %s1589_s11, %s1407_s5 }
  0x25   : > { %p1404_p2 = pnand %p1402_p0, %p1388_p1  ;;  %p1410_p4 = scmp.lt.s32.totalorder %s1408_s6, %s1401_s26 }
  0x27   : > { %p1405_p12 = pneg %p1404_p2  ;;  %p1411_p5 = por %p1410_p4, %p1409_p11 }
  0x29   : > { %p1412_p7 = pnand %p1411_p5, %p1405_p12 }
  0x2b   : > { %1415 = shalt.err (!%p1412_p7)
}
  0x2c   : > { %s1485_s7 = smov 256   ;;  %s1486_s8 = smov 16  }
  0x2d   : > { %1215 = dma.hbm_to_vmem [thread:$0]  (!%p1585_p13), %s1581_s9, 1024, %s1589_s11, %s1591_s13, %s1485_s7, %s1485_s7, %s1486_s8  }
  0x2e   : > { %p1174_p9 = scmp.ge.s32.totalorder %s1482_s20, 1  ;;  %p182_p1 = scmp.lt.s32.totalorder %s1482_s20, 3 }
  0x30   : > { %p183_p3 = pnand %p1174_p9, %p182_p1 }
  0x31   : > { %s1622_s10 = sand.u32 (!%p183_p3), 1, %s1474_s18  }
  0x32   : > { %186 = sbr.rel (%p183_p3) target bundleno = 840 (0x348), region = 36  ;;  %s1175_s14 = sshll.u32 (!%p183_p3), %s1622_s10, 6 }
  0x33   : > { %s189_s15 = scalar_lea.sflag (!%p183_p3), [#allocation4], %s1622_s10  ;;  %s1628_s16 = scalar_lea.vmem (!%p183_p3), [#allocation3], %s1175_s14 }
  0x39   : > { %1461 = dma.done.wait (%p1561_p6), %s189_s15, 1024  }
  0x3a   : > { %1463 = vsyncadd (%p1561_p6), %s189_s15, 4294966272  ;;  %v226_v0 = vlaneseq  ;;  %v1639_v6 = vld [vmem:[%s1628_s16] sm:$0xff]  ;;  %v1642_v7 = vld [vmem:[%s1628_s16 + $0x10] sm:$0xff]  ;;  %s225_s27 = sld [smem:[#allocation2]]  ;;  %vm800_vm2 = vcmask 15360   ;;  %s1997_s9 = scalar_lea.vmem [#allocation6], %s1175_s14 }
  0x3b   : > { %296 = vadd.xlane.f32.xlu1 %v1639_v6  ;;  %v1649_v9 = vld [vmem:[%s1628_s16 + $0x18] sm:$0xff]  ;;  %v1655_v11 = vld [vmem:[%s1628_s16 + $0x8] sm:$0xff]  ;;  %v1673_v19 = vld [vmem:[%s1628_s16 + $0x20] sm:$0xff]  ;;  %s1207_s14 = sshll.u32 %s1539_s0, 10  ;;  %s1095_s11 = sshll.u32 %s1997_s9, 4  ;;  %s2029_s11 = int_to_ptr.vmem [resolvable:$true] %s1095_s11 }
  0x3c   : > { %v227_v1 = vand.u32 127, %v226_v0  ;;  %v334_v13 = vadd.f32 %v1649_v9, %v1642_v7  ;;  %v331_v14 = vadd.f32 %v1655_v11, %v1639_v6  ;;  %v1676_v20 = vld [vmem:[%s1628_s16 + $0x28] sm:$0xff]  ;;  %v1688_v25 = vld [vmem:[%s1628_s16 + $0x30] sm:$0xff]  ;;  %v1691_v26 = vld [vmem:[%s1628_s16 + $0x38] sm:$0xff]  ;;  %s2027_s21 = scalar_lea.hbm %s2080_s4, %s1207_s14  ;;  %s1082_s0 = scalar_lea.sflag [#allocation5], %s1622_s10 }
  0x3d   : > { %v337_v23 = vadd.f32 %v1676_v20, %v1673_v19  ;;  %v340_v29 = vadd.f32 %v1691_v26, %v1688_v25  ;;  %s1416_s23 = scalar_lea.vmem %s2029_s11, 1024  ;;  %p2091_p11 = scmp.ne.s32.totalorder %s2084_s28, 0 }
  0x3e   : > { %v235_v2 = vand.u32 15, %v227_v1  ;;  %v228_v3 = vadd.s32 128, %v227_v1  ;;  %p1417_p6 = scmp.ne.s32.totalorder %s2029_s11, %s1416_s23  ;;  %s1487_s24 = smov [#allocation6]  }
  0x3f   : > { %299 = vadd.xlane.f32.xlu1 %v1642_v7  ;;  %s1420_s26 = sshll.u32 %s1487_s24, 4  ;;  %s1421_s26 = int_to_ptr.vmem [resolvable:$false] %s1420_s26 }
  0x40   : > { %vm1634_vm0 = vcmp.lt.s32.totalorder %v235_v2, 8  ;;  %v242_v5 = vand.u32 15, %v228_v3  ;;  %p1418_p12 = pnand %p1417_p6, %p2091_p11  ;;  %s1422_s30 = scalar_lea.vmem %s1421_s26, 2048 }
  0x41   : > { %v263_v8 = vsel %vm1634_vm0, %v1639_v6, 0.0  ;;  %v265_v10 = vsel %vm1634_vm0, %v1642_v7, 0.0  ;;  %v267_v21 = vsel %vm1634_vm0, %v1673_v19, 0.0  ;;  %v269_v27 = vsel %vm1634_vm0, %v1688_v25, 0.0  ;;  %p1423_p8 = scmp.lt.s32.totalorder %s2029_s11, %s1421_s26  ;;  %p1424_p10 = scmp.lt.s32.totalorder %s1422_s30, %s1416_s23 }
  0x42   : > { %272 = vadd.xlane.f32.xlu0 %v263_v8  ;;  %vm1657_vm1 = vcmp.lt.s32.totalorder %v242_v5, 8  ;;  %p1419_p13 = pneg %p1418_p12 }
  0x43   : > { %v314_v15 = vsel %vm1657_vm1, %v1649_v9, 0.0  ;;  %v312_v16 = vsel %vm1657_vm1, %v1655_v11, 0.0  ;;  %335 = vadd.xlane.f32.xlu1 %v334_v13  ;;  %v316_v22 = vsel %vm1657_vm1, %v1676_v20, 0.0  ;;  %v318_v28 = vsel %vm1657_vm1, %v1691_v26, 0.0  ;;  %p1425_p0 = por %p1424_p10, %p1423_p8 }
  0x44   : > { %v322_v17 = vadd.f32 %v314_v15, %v265_v10  ;;  %v319_v18 = vadd.f32 %v312_v16, %v263_v8  ;;  %v325_v24 = vadd.f32 %v316_v22, %v267_v21  ;;  %v328_v30 = vadd.f32 %v318_v28, %v269_v27 }
  0x45   : > { %p1426_p2 = pnand %p1425_p0, %p1419_p13 }
  0x46   : > { %275 = vadd.xlane.f32.xlu0 %v265_v10 }
  0x47   : > { %323 = vadd.xlane.f32.xlu1 %v322_v17 }
  0x4a   : > { %332 = vadd.xlane.f32.xlu0 %v331_v14 }
  0x4b   : > { %302 = vadd.xlane.f32.xlu1 %v1673_v19 }
  0x4e   : > { %320 = vadd.xlane.f32.xlu0 %v319_v18 }
  0x4f   : > { %338 = vadd.xlane.f32.xlu1 %v337_v23 }
  0x52   : > { %278 = vadd.xlane.f32.xlu0 %v267_v21 }
  0x53   : > { %305 = vadd.xlane.f32.xlu1 %v1688_v25 }
  0x56   : > { %326 = vadd.xlane.f32.xlu0 %v325_v24 }
  0x57   : > { %341 = vadd.xlane.f32.xlu1 %v340_v29 }
  0x5a   : > { %281 = vadd.xlane.f32.xlu0 %v269_v27 }
  0x5e   : > { %329 = vadd.xlane.f32.xlu0 %v328_v30 }
  0xc8   : > { %v297_v31 = vpop.xlane.xlu1 %296 }
  0xcc   : > { %v300_v36 = vpop.xlane.xlu1 %299 }
  0xcf   : > { %v273_v32 = vpop.xlane.xlu0 %272 }
  0xd0   : > { %v343_v33 = vsub.f32 %v297_v31, %v273_v32  ;;  %v359_v34 = vmul.f32 0.015625, %v273_v32  ;;  %v336_v43 = vpop.xlane.xlu1 %335 }
  0xd1   : > { %v352_v58 = vsub.f32 %v336_v43, %v300_v36 }
  0xd2   : > { %v363_v35 = vmul.f32 0.015625, %v343_v33 }
  0xd3   : > { %v276_v37 = vpop.xlane.xlu0 %275 }
  0xd4   : > { %v375_v38 = vsel %vm1634_vm0, %v359_v34, %v363_v35  ;;  %v344_v39 = vsub.f32 %v300_v36, %v276_v37  ;;  %v360_v41 = vmul.f32 0.015625, %v276_v37  ;;  %v324_v48 = vpop.xlane.xlu1 %323 }
  0xd5   : > { %v399_v40 = vsub.f32 %v1639_v6, %v375_v38  ;;  %v348_v55 = vsub.f32 %v324_v48, %v276_v37 }
  0xd6   : > { %v364_v42 = vmul.f32 0.015625, %v344_v39 }
  0xd7   : > { %v333_v44 = vpop.xlane.xlu0 %332  ;;  %v1705_v45 = vmul.f32 %v399_v40, %v399_v40  ;;  %v356_v63 = vsub.f32 %v352_v58, %v348_v55  ;;  %v368_v21 = vmul.f32 0.015625, %v348_v55 }
  0xd8   : > { %v377_v46 = vsel %vm1634_vm0, %v360_v41, %v364_v42  ;;  %v303_v53 = vpop.xlane.xlu1 %302  ;;  %v351_v54 = vsub.f32 %v333_v44, %v297_v31 }
  0xd9   : > { %444 = vadd.xlane.f32.xlu0 %v1705_v45  ;;  %v401_v47 = vsub.f32 %v1642_v7, %v377_v46  ;;  %v1716_v51 = vsel %vm1634_vm0, %v1705_v45, 0.0  ;;  %v372_v14 = vmul.f32 0.015625, %v356_v63 }
  0xdb   : > { %v321_v49 = vpop.xlane.xlu0 %320  ;;  %v1711_v50 = vmul.f32 %v401_v47, %v401_v47  ;;  %v386_v30 = vsel %vm1657_vm1, %v368_v21, %v372_v14 }
  0xdc   : > { %v347_v52 = vsub.f32 %v321_v49, %v273_v32  ;;  %v339_v62 = vpop.xlane.xlu1 %338  ;;  %v402_v41 = vsub.f32 %v1649_v9, %v386_v30 }
  0xdd   : > { %447 = vadd.xlane.f32.xlu1 %v1711_v50  ;;  %424 = vadd.xlane.f32.xlu0 %v1716_v51  ;;  %v353_v0 = vsub.f32 %v339_v62, %v303_v53 }
  0xde   : > { %v355_v59 = vsub.f32 %v351_v54, %v347_v52  ;;  %v367_v15 = vmul.f32 0.015625, %v347_v52  ;;  %v1751_v49 = vmul.f32 %v402_v41, %v402_v41  ;;  %v417_v52 = vsel %vm1634_vm0, %v1711_v50, 0.0 }
  0xdf   : > { %v279_v56 = vpop.xlane.xlu0 %278 }
  0xe0   : > { %v345_v57 = vsub.f32 %v303_v53, %v279_v56  ;;  %v361_v60 = vmul.f32 0.015625, %v279_v56  ;;  %v371_v5 = vmul.f32 0.015625, %v355_v59  ;;  %v306_v13 = vpop.xlane.xlu1 %305  ;;  %v458_v63 = vsel %vm1657_vm1, %v1751_v49, 0.0 }
  0xe2   : > { %v365_v61 = vmul.f32 0.015625, %v345_v57  ;;  %v384_v22 = vsel %vm1657_vm1, %v367_v15, %v371_v5  ;;  %v478_v57 = vadd.f32 %v1751_v49, %v1711_v50  ;;  %v1782_v5 = vstv %s225_s27 }
  0xe3   : > { %v327_v1 = vpop.xlane.xlu0 %326  ;;  %v400_v36 = vsub.f32 %v1655_v11, %v384_v22 }
  0xe4   : > { %v379_v2 = vsel %vm1634_vm0, %v361_v60, %v365_v61  ;;  %v349_v3 = vsub.f32 %v327_v1, %v279_v56  ;;  %v342_v29 = vpop.xlane.xlu1 %341 }
  0xe5   : > { %v403_v8 = vsub.f32 %v1673_v19, %v379_v2  ;;  %v354_v31 = vsub.f32 %v342_v29, %v306_v13  ;;  %v1742_v44 = vmul.f32 %v400_v36, %v400_v36 }
  0xe6   : > { %v357_v10 = vsub.f32 %v353_v0, %v349_v3  ;;  %v369_v33 = vmul.f32 0.015625, %v349_v3  ;;  %v466_v0 = vadd.f32 %v458_v63, %v417_v52 }
  0xe7   : > { %v282_v16 = vpop.xlane.xlu0 %281  ;;  %v1723_v17 = vmul.f32 %v403_v8, %v403_v8  ;;  %v475_v53 = vadd.f32 %v1742_v44, %v1705_v45  ;;  %v456_v54 = vsel %vm1657_vm1, %v1742_v44, 0.0 }
  0xe8   : > { %v346_v18 = vsub.f32 %v306_v13, %v282_v16  ;;  %v373_v24 = vmul.f32 0.015625, %v357_v10  ;;  %v362_v27 = vmul.f32 0.015625, %v282_v16  ;;  %v463_v58 = vadd.f32 %v456_v54, %v1716_v51 }
  0xe9   : > { %450 = vadd.xlane.f32.xlu1 %v1723_v17  ;;  %v419_v23 = vsel %vm1634_vm0, %v1723_v17, 0.0 }
  0xea   : > { %v366_v28 = vmul.f32 0.015625, %v346_v18  ;;  %430 = vadd.xlane.f32.xlu0 %v419_v23  ;;  %v388_v38 = vsel %vm1657_vm1, %v369_v33, %v373_v24 }
  0xeb   : > { %v330_v32 = vpop.xlane.xlu0 %329  ;;  %v404_v47 = vsub.f32 %v1676_v20, %v388_v38 }
  0xec   : > { %v381_v34 = vsel %vm1634_vm0, %v362_v27, %v366_v28  ;;  %v350_v35 = vsub.f32 %v330_v32, %v282_v16 }
  0xed   : > { %v405_v37 = vsub.f32 %v1688_v25, %v381_v34  ;;  %v1761_v55 = vmul.f32 %v404_v47, %v404_v47 }
  0xee   : > { %v358_v39 = vsub.f32 %v354_v31, %v350_v35  ;;  %v370_v42 = vmul.f32 0.015625, %v350_v35 }
  0xef   : > { %v1739_v40 = vmul.f32 %v405_v37, %v405_v37  ;;  %v460_v59 = vsel %vm1657_vm1, %v1761_v55, 0.0  ;;  %v481_v61 = vadd.f32 %v1761_v55, %v1723_v17 }
  0xf0   : > { %v374_v43 = vmul.f32 0.015625, %v358_v39  ;;  %v469_v62 = vadd.f32 %v460_v59, %v419_v23 }
  0xf1   : > { %453 = vadd.xlane.f32.xlu1 %v1739_v40  ;;  %v421_v46 = vsel %vm1634_vm0, %v1739_v40, 0.0 }
  0xf2   : > { %v390_v48 = vsel %vm1657_vm1, %v370_v42, %v374_v43  ;;  %433 = vadd.xlane.f32.xlu0 %v421_v46 }
  0xf3   : > { %v406_v56 = vsub.f32 %v1691_v26, %v390_v48 }
  0xf5   : > { %427 = vadd.xlane.f32.xlu1 %v417_v52  ;;  %v1770_v60 = vmul.f32 %v406_v56, %v406_v56 }
  0xf6   : > { %476 = vadd.xlane.f32.xlu0 %v475_v53 }
  0xf7   : > { %v462_v51 = vsel %vm1657_vm1, %v1770_v60, 0.0  ;;  %v484_v2 = vadd.f32 %v1770_v60, %v1739_v40 }
  0xf8   : > { %v472_v1 = vadd.f32 %v462_v51, %v421_v46 }
  0xf9   : > { %479 = vadd.xlane.f32.xlu1 %v478_v57 }
  0xfa   : > { %464 = vadd.xlane.f32.xlu0 %v463_v58 }
  0xfd   : > { %482 = vadd.xlane.f32.xlu1 %v481_v61 }
  0xfe   : > { %470 = vadd.xlane.f32.xlu0 %v469_v62 }
 0x101   : > { %467 = vadd.xlane.f32.xlu1 %v466_v0 }
 0x102   : > { %473 = vadd.xlane.f32.xlu0 %v472_v1 }
 0x105   : > { %485 = vadd.xlane.f32.xlu1 %v484_v2 }
 0x166   : > { %v445_v3 = vpop.xlane.xlu0 %444 }
 0x16a   : > { %v425_v8 = vpop.xlane.xlu0 %424  ;;  %v1786_v22 = vpop.xlane.xlu1 %447 }
 0x16b   : > { %v487_v10 = vsub.f32 %v445_v3, %v425_v8  ;;  %v503_v13 = vmul.f32 0.015873017, %v425_v8 }
 0x16d   : > { %v508_v14 = vadd.f32 %v1782_v5, %v503_v13  ;;  %v528_v15 = vmul.f32 0.015873017, %v487_v10 }
 0x16f   : > { %v512_v16 = vmul.f32 4.0, %v508_v14  ;;  %v532_v18 = vadd.f32 %v528_v15, %v1782_v5 }
 0x171   : > { %v536_v21 = vmul.f32 4.0, %v532_v18  ;;  %v516_v23 = vmax.f32 %v512_v16, 1e-30 }
 0x173   : > { %v540_v24 = vmax.f32 %v536_v21, 1e-30 }
 0x175   : > { %1258 = vrcp.f32 %v540_v24 }
 0x176   : > { %1260 = vrcp.f32 %v516_v23  ;;  %v1788_v27 = vpop.xlane.xlu1 %450 }
 0x177   : > { %v431_v28 = vpop.xlane.xlu0 %430 }
 0x178   : > { %v489_v29 = vsub.f32 %v1788_v27, %v431_v28  ;;  %v505_v30 = vmul.f32 0.015873017, %v431_v28 }
 0x17a   : > { %v510_v31 = vadd.f32 %v1782_v5, %v505_v30  ;;  %v530_v32 = vmul.f32 0.015873017, %v489_v29 }
 0x17c   : > { %v514_v33 = vmul.f32 4.0, %v510_v31  ;;  %v534_v34 = vadd.f32 %v530_v32, %v1782_v5 }
 0x17e   : > { %v518_v35 = vmax.f32 %v514_v33, 1e-30  ;;  %v538_v36 = vmul.f32 4.0, %v534_v34  ;;  %v1793_v37 = vpop.xlane.xlu1 %453 }
 0x17f   : > { %v1259_v38 = vpop.eup %1258  ;;  %v1795_v39 = vpop.xlane.xlu0 %433 }
 0x180   : > { %v1261_v41 = vpop.eup %1260  ;;  %v542_v42 = vmax.f32 %v538_v36, 1e-30  ;;  %v490_v43 = vsub.f32 %v1793_v37, %v1795_v39  ;;  %v506_v46 = vmul.f32 0.015873017, %v1795_v39  ;;  %1262 = vrcp.f32 %v518_v35 }
 0x181   : > { %v600_v47 = vsel %vm1634_vm0, %v1261_v41, %v1259_v38 }
 0x182   : > { %1264 = vrcp.f32 %v542_v42  ;;  %v511_v48 = vadd.f32 %v1782_v5, %v506_v46  ;;  %v531_v52 = vmul.f32 0.015873017, %v490_v43  ;;  %v428_v53 = vpop.xlane.xlu1 %427  ;;  %v624_v54 = vmul.f32 %v600_v47, %v1705_v45 }
 0x183   : > { %v488_v56 = vsub.f32 %v1786_v22, %v428_v53  ;;  %v504_v57 = vmul.f32 0.015873017, %v428_v53  ;;  %v477_v58 = vpop.xlane.xlu0 %476 }
 0x184   : > { %v515_v59 = vmul.f32 4.0, %v511_v48  ;;  %v535_v61 = vadd.f32 %v531_v52, %v1782_v5  ;;  %v632_v62 = vadd.f32 0.5, %v624_v54  ;;  %v495_v16 = vsub.f32 %v477_v58, %v445_v3 }
 0x185   : > { %v509_v63 = vadd.f32 %v1782_v5, %v504_v57  ;;  %v529_v51 = vmul.f32 0.015873017, %v488_v56 }
 0x186   : > { %v539_v0 = vmul.f32 4.0, %v535_v61  ;;  %v480_v1 = vpop.xlane.xlu1 %479  ;;  %v1177_v2 = vmul.f32 -1.442695, %v632_v62  ;;  %v519_v10 = vmax.f32 %v515_v59, 1e-30 }
 0x187   : > { %v513_v13 = vmul.f32 4.0, %v509_v63  ;;  %v533_v14 = vadd.f32 %v529_v51, %v1782_v5  ;;  %v465_v15 = vpop.xlane.xlu0 %464  ;;  %v496_v48 = vsub.f32 %v480_v1, %v1786_v22 }
 0x188   : > { %v543_v45 = vmax.f32 %v539_v0, 1e-30  ;;  %v491_v18 = vsub.f32 %v465_v15, %v425_v8  ;;  %1266 = vpow2.f32 %v1177_v2 }
 0x189   : > { %v517_v21 = vmax.f32 %v513_v13, 1e-30  ;;  %v537_v23 = vmul.f32 4.0, %v533_v14 }
 0x18a   : > { %1268 = vrcp.f32 %v543_v45  ;;  %v499_v24 = vsub.f32 %v495_v16, %v491_v18  ;;  %v552_v29 = vmul.f32 0.015873017, %v491_v18  ;;  %v483_v30 = vpop.xlane.xlu1 %482  ;;  %v1263_v31 = vpop.eup %1262 }
 0x18b   : > { %1270 = vrcp.f32 %v519_v10  ;;  %v541_v32 = vmax.f32 %v537_v23, 1e-30  ;;  %v497_v33 = vsub.f32 %v483_v30, %v1788_v27  ;;  %v471_v34 = vpop.xlane.xlu0 %470 }
 0x18c   : > { %v1265_v35 = vpop.eup %1264  ;;  %1272 = vrcp.f32 %v517_v21  ;;  %v556_v36 = vadd.f32 %v552_v29, %v1782_v5  ;;  %v576_v38 = vmul.f32 0.015873017, %v499_v24  ;;  %v493_v3 = vsub.f32 %v471_v34, %v431_v28 }
 0x18d   : > { %1274 = vrcp.f32 %v541_v32  ;;  %v604_v8 = vsel %vm1634_vm0, %v1263_v31, %v1265_v35 }
 0x18e   : > { %v560_v41 = vmul.f32 4.0, %v556_v36  ;;  %v580_v42 = vadd.f32 %v576_v38, %v1782_v5  ;;  %v501_v43 = vsub.f32 %v497_v33, %v493_v3  ;;  %v554_v46 = vmul.f32 0.015873017, %v493_v3  ;;  %v468_v47 = vpop.xlane.xlu1 %467 }
 0x18f   : > { %v492_v27 = vsub.f32 %v468_v47, %v428_v53  ;;  %v474_v52 = vpop.xlane.xlu0 %473  ;;  %v628_v54 = vmul.f32 %v604_v8, %v1723_v17 }
 0x190   : > { %v564_v56 = vmax.f32 %v560_v41, 1e-30  ;;  %v584_v57 = vmul.f32 4.0, %v580_v42  ;;  %v558_v28 = vadd.f32 %v554_v46, %v1782_v5  ;;  %v578_v58 = vmul.f32 0.015873017, %v501_v43 }
 0x191   : > { %v500_v59 = vsub.f32 %v496_v48, %v492_v27  ;;  %v553_v61 = vmul.f32 0.015873017, %v492_v27  ;;  %v494_v62 = vsub.f32 %v474_v52, %v1795_v39  ;;  %v636_v45 = vadd.f32 0.5, %v628_v54 }
 0x192   : > { %1276 = vrcp.f32 %v564_v56  ;;  %v588_v63 = vmax.f32 %v584_v57, 1e-30  ;;  %v562_v51 = vmul.f32 4.0, %v558_v28  ;;  %v582_v0 = vadd.f32 %v578_v58, %v1782_v5  ;;  %v486_v2 = vpop.xlane.xlu1 %485  ;;  %v1267_v22 = vpop.eup %1266 }
 0x193   : > { %v557_v53 = vadd.f32 %v553_v61, %v1782_v5  ;;  %v577_v1 = vmul.f32 0.015873017, %v500_v59  ;;  %v555_v17 = vmul.f32 0.015873017, %v494_v62  ;;  %v498_v10 = vsub.f32 %v486_v2, %v1793_v37 }
 0x194   : > { %v1269_v13 = vpop.eup %1268  ;;  %1278 = vrcp.f32 %v588_v63  ;;  %v566_v14 = vmax.f32 %v562_v51, 1e-30  ;;  %v586_v15 = vmul.f32 4.0, %v582_v0  ;;  %v664_v30 = vadd.f32 1.0, %v1267_v22 }
 0x195   : > { %v1271_v16 = vpop.eup %1270  ;;  %v561_v39 = vmul.f32 4.0, %v557_v53  ;;  %v581_v18 = vadd.f32 %v577_v1, %v1782_v5  ;;  %v559_v21 = vadd.f32 %v555_v17, %v1782_v5  ;;  %v502_v23 = vsub.f32 %v498_v10, %v494_v62 }
 0x196   : > { %v1273_v24 = vpop.eup %1272  ;;  %1280 = vrcp.f32 %v566_v14  ;;  %v590_v29 = vmax.f32 %v586_v15, 1e-30  ;;  %v606_v31 = vsel %vm1634_vm0, %v1271_v16, %v1269_v13  ;;  %v1181_v36 = vmul.f32 -1.442695, %v636_v45 }
 0x197   : > { %v1275_v37 = vpop.eup %1274  ;;  %v565_v32 = vmax.f32 %v561_v39, 1e-30  ;;  %v585_v33 = vmul.f32 4.0, %v581_v18  ;;  %v563_v34 = vmul.f32 4.0, %v559_v21  ;;  %v579_v35 = vmul.f32 0.015873017, %v502_v23 }
 0x198   : > { %1282 = vrcp.f32 %v590_v29  ;;  %v630_v38 = vmul.f32 %v606_v31, %v1739_v40  ;;  %v602_v3 = vsel %vm1634_vm0, %v1273_v24, %v1275_v37 }
 0x199   : > { %1284 = vrcp.f32 %v565_v32  ;;  %v589_v8 = vmax.f32 %v585_v33, 1e-30  ;;  %v567_v41 = vmax.f32 %v563_v34, 1e-30  ;;  %v583_v42 = vadd.f32 %v579_v35, %v1782_v5 }
 0x19a   : > { %1286 = vrcp.f32 %v664_v30  ;;  %v638_v43 = vadd.f32 0.5, %v630_v38  ;;  %v626_v46 = vmul.f32 %v602_v3, %v1711_v50 }
 0x19b   : > { %1288 = vrcp.f32 %v589_v8  ;;  %v587_v47 = vmul.f32 4.0, %v583_v42 }
 0x19c   : > { %v1277_v48 = vpop.eup %1276  ;;  %1290 = vrcp.f32 %v567_v41  ;;  %v1183_v27 = vmul.f32 -1.442695, %v638_v43  ;;  %v634_v52 = vadd.f32 0.5, %v626_v46 }
 0x19d   : > { %v591_v54 = vmax.f32 %v587_v47, 1e-30  ;;  %1292 = vpow2.f32 %v1181_v36 }
 0x19e   : > { %v1279_v40 = vpop.eup %1278  ;;  %1294 = vpow2.f32 %v1183_v27  ;;  %v1179_v56 = vmul.f32 -1.442695, %v634_v52 }
 0x19f   : > { %1296 = vrcp.f32 %v591_v54  ;;  %v609_v57 = vsel %vm1657_vm1, %v1277_v48, %v1279_v40 }
 0x1a0   : > { %v1281_v5 = vpop.eup %1280  ;;  %1298 = vpow2.f32 %v1179_v56  ;;  %v625_v28 = vmul.f32 %v609_v57, %v1742_v44 }
 0x1a2   : > { %v1283_v50 = vpop.eup %1282  ;;  %v633_v58 = vadd.f32 0.5, %v625_v28 }
 0x1a3   : > { %v1285_v59 = vpop.eup %1284  ;;  %v613_v61 = vsel %vm1657_vm1, %v1281_v5, %v1283_v50 }
 0x1a4   : > { %v1287_v62 = vpop.eup %1286  ;;  %v1178_v63 = vmul.f32 -1.442695, %v633_v58  ;;  %v629_v51 = vmul.f32 %v613_v61, %v1761_v55 }
 0x1a5   : > { %v1289_v0 = vpop.eup %1288  ;;  %v1836_v2 = vmul.f32 %v1287_v62, %v1639_v6 }
 0x1a6   : > { %v1291_v22 = vpop.eup %1290  ;;  %1300 = vpow2.f32 %v1178_v63  ;;  %v611_v53 = vsel %vm1657_vm1, %v1285_v59, %v1289_v0  ;;  %v637_v44 = vadd.f32 0.5, %v629_v51 }
 0x1a7   : > { %v1293_v1 = vpop.eup %1292  ;;  %733 = vadd.xlane.f32.xlu0 %v1836_v2  ;;  %v627_v17 = vmul.f32 %v611_v53, %v1751_v49  ;;  %v704_v6 = vsel %vm1634_vm0, %v1836_v2, 0.0 }
 0x1a8   : > { %v1295_v10 = vpop.eup %1294  ;;  %v668_v13 = vadd.f32 1.0, %v1293_v1  ;;  %v1182_v14 = vmul.f32 -1.442695, %v637_v44 }
 0x1a9   : > { %v1297_v15 = vpop.eup %1296  ;;  %v670_v55 = vadd.f32 1.0, %v1295_v10  ;;  %v635_v45 = vadd.f32 0.5, %v627_v17  ;;  %v1908_v10 = vld [vmem:[%s2077_s1] sm:$0xff] }
 0x1aa   : > { %v1299_v16 = vpop.eup %1298  ;;  %1302 = vrcp.f32 %v668_v13  ;;  %v615_v39 = vsel %vm1657_vm1, %v1291_v22, %v1297_v15 }
 0x1ab   : > { %713 = vadd.xlane.f32.xlu0 %v704_v6  ;;  %1304 = vrcp.f32 %v670_v55  ;;  %v666_v18 = vadd.f32 1.0, %v1299_v16  ;;  %v1180_v21 = vmul.f32 -1.442695, %v635_v45  ;;  %v631_v49 = vmul.f32 %v615_v39, %v1770_v60  ;;  %v1915_v16 = vld [vmem:[%s2077_s1 + $0x10] sm:$0xff] }
 0x1ac   : > { %1306 = vpow2.f32 %v1182_v14 }
 0x1ad   : > { %1308 = vrcp.f32 %v666_v18  ;;  %v639_v23 = vadd.f32 0.5, %v631_v49 }
 0x1ae   : > { %1310 = vpow2.f32 %v1180_v21 }
 0x1af   : > { %v1184_v24 = vmul.f32 -1.442695, %v639_v23 }
 0x1b0   : > { %v1301_v29 = vpop.eup %1300 }
 0x1b1   : > { %v665_v30 = vadd.f32 1.0, %v1301_v29  ;;  %1312 = vpow2.f32 %v1184_v24 }
 0x1b3   : > { %1314 = vrcp.f32 %v665_v30  ;;  %v1927_v30 = vld [vmem:[%s2077_s1 + $0x18] sm:$0xff] }
 0x1b4   : > { %v1303_v31 = vpop.eup %1302 }
 0x1b5   : > { %v1305_v37 = vpop.eup %1304  ;;  %v1849_v32 = vmul.f32 %v1303_v31, %v1673_v19 }
 0x1b6   : > { %v1307_v33 = vpop.eup %1306  ;;  %v1852_v34 = vmul.f32 %v1305_v37, %v1688_v25 }
 0x1b7   : > { %v1309_v35 = vpop.eup %1308  ;;  %v708_v60 = vsel %vm1634_vm0, %v1849_v32, 0.0  ;;  %v669_v36 = vadd.f32 1.0, %v1307_v33 }
 0x1b8   : > { %v1311_v38 = vpop.eup %1310  ;;  %719 = vadd.xlane.f32.xlu0 %v708_v60  ;;  %v1858_v3 = vmul.f32 %v1309_v35, %v1642_v7  ;;  %v710_v19 = vsel %vm1634_vm0, %v1852_v34, 0.0 }
 0x1b9   : > { %v667_v8 = vadd.f32 1.0, %v1311_v38  ;;  %1316 = vrcp.f32 %v669_v36 }
 0x1ba   : > { %736 = vadd.xlane.f32.xlu1 %v1858_v3 }
 0x1bb   : > { %v1313_v25 = vpop.eup %1312  ;;  %1318 = vrcp.f32 %v667_v8 }
 0x1bc   : > { %722 = vadd.xlane.f32.xlu0 %v710_v19  ;;  %v671_v41 = vadd.f32 1.0, %v1313_v25 }
 0x1bd   : > { %v1315_v42 = vpop.eup %1314 }
 0x1be   : > { %739 = vadd.xlane.f32.xlu1 %v1849_v32  ;;  %v1866_v43 = vmul.f32 %v1315_v42, %v1655_v11  ;;  %1320 = vrcp.f32 %v671_v41  ;;  %v706_v11 = vsel %vm1634_vm0, %v1858_v3, 0.0 }
 0x1c0   : > { %v764_v7 = vadd.f32 %v1866_v43, %v1836_v2  ;;  %v745_v46 = vsel %vm1657_vm1, %v1866_v43, 0.0 }
 0x1c1   : > { %v752_v48 = vadd.f32 %v745_v46, %v704_v6  ;;  %v1920_v6 = vld [vmem:[%s2077_s1 + $0x8] sm:$0xff] }
 0x1c2   : > { %742 = vadd.xlane.f32.xlu1 %v1852_v34  ;;  %765 = vadd.xlane.f32.xlu0 %v764_v7 }
 0x1c3   : > { %v1317_v47 = vpop.eup %1316 }
 0x1c4   : > { %v1875_v27 = vmul.f32 %v1317_v47, %v1676_v20 }
 0x1c5   : > { %v1319_v52 = vpop.eup %1318 }
 0x1c6   : > { %716 = vadd.xlane.f32.xlu1 %v706_v11  ;;  %753 = vadd.xlane.f32.xlu0 %v752_v48  ;;  %v1881_v54 = vmul.f32 %v1319_v52, %v1649_v9  ;;  %v749_v40 = vsel %vm1657_vm1, %v1875_v27, 0.0  ;;  %v770_v9 = vadd.f32 %v1875_v27, %v1849_v32 }
 0x1c7   : > { %v758_v20 = vadd.f32 %v749_v40, %v708_v60 }
 0x1c8   : > { %v1321_v56 = vpop.eup %1320  ;;  %v767_v57 = vadd.f32 %v1881_v54, %v1858_v3  ;;  %v747_v58 = vsel %vm1657_vm1, %v1881_v54, 0.0 }
 0x1c9   : > { %v1889_v5 = vmul.f32 %v1321_v56, %v1691_v26  ;;  %v755_v59 = vadd.f32 %v747_v58, %v706_v11 }
 0x1ca   : > { %768 = vadd.xlane.f32.xlu1 %v767_v57  ;;  %759 = vadd.xlane.f32.xlu0 %v758_v20 }
 0x1cb   : > { %v751_v28 = vsel %vm1657_vm1, %v1889_v5, 0.0  ;;  %v773_v26 = vadd.f32 %v1889_v5, %v1852_v34 }
 0x1cc   : > { %v761_v50 = vadd.f32 %v751_v28, %v710_v19 }
 0x1ce   : > { %771 = vadd.xlane.f32.xlu1 %v770_v9  ;;  %762 = vadd.xlane.f32.xlu0 %v761_v50 }
 0x1d2   : > { %756 = vadd.xlane.f32.xlu1 %v755_v59 }
 0x1d6   : > { %774 = vadd.xlane.f32.xlu1 %v773_v26 }
 0x234   : > { %v734_v61 = vpop.xlane.xlu0 %733 }
 0x238   : > { %v714_v62 = vpop.xlane.xlu0 %713 }
 0x239   : > { %v776_v53 = vsub.f32 %v734_v61, %v714_v62  ;;  %v792_v44 = vmul.f32 0.015625, %v714_v62 }
 0x23b   : > { %v855_v14 = vmul.f32 0.015625, %v776_v53  ;;  %v796_v45 = vmul.f32 %v792_v44, %v1908_v10 }
 0x23d   : > { %v859_v29 = vmul.f32 %v855_v14, %v1908_v10  ;;  %v801_v60 = vsel %vm800_vm2, %v796_v45, 0.0 }
 0x23f   : > { %v863_v47 = vsel %vm800_vm2, %v859_v29, 0.0 }
 0x245   : > { %v720_v63 = vpop.xlane.xlu0 %719 }
 0x246   : > { %v794_v15 = vmul.f32 0.015625, %v720_v63 }
 0x247   : > { %v1901_v51 = vpop.xlane.xlu1 %736 }
 0x248   : > { %v798_v31 = vmul.f32 %v794_v15, %v1915_v16 }
 0x249   : > { %v723_v0 = vpop.xlane.xlu0 %722 }
 0x24a   : > { %v795_v21 = vmul.f32 0.015625, %v723_v0  ;;  %v804_v48 = vsel %vm800_vm2, %v798_v31, 0.0 }
 0x24b   : > { %v740_v22 = vpop.xlane.xlu1 %739 }
 0x24c   : > { %v778_v13 = vsub.f32 %v740_v22, %v720_v63  ;;  %v799_v8 = vmul.f32 %v795_v21, %v1927_v30 }
 0x24e   : > { %v857_v49 = vmul.f32 0.015625, %v778_v13  ;;  %v806_v9 = vsel %vm800_vm2, %v799_v8, 0.0 }
 0x24f   : > { %v1903_v1 = vpop.xlane.xlu1 %742  ;;  %v766_v17 = vpop.xlane.xlu0 %765 }
 0x250   : > { %v779_v55 = vsub.f32 %v1903_v1, %v723_v0  ;;  %v861_v25 = vmul.f32 %v857_v49, %v1915_v16  ;;  %v784_v7 = vsub.f32 %v766_v17, %v734_v61 }
 0x252   : > { %v858_v37 = vmul.f32 0.015625, %v779_v55  ;;  %v866_v50 = vsel %vm800_vm2, %v861_v25, 0.0 }
 0x253   : > { %v717_v39 = vpop.xlane.xlu1 %716  ;;  %v754_v18 = vpop.xlane.xlu0 %753 }
 0x254   : > { %v777_v23 = vsub.f32 %v1901_v51, %v717_v39  ;;  %v793_v24 = vmul.f32 0.015625, %v717_v39  ;;  %v780_v36 = vsub.f32 %v754_v18, %v714_v62  ;;  %v862_v52 = vmul.f32 %v858_v37, %v1927_v30 }
 0x256   : > { %v797_v33 = vmul.f32 %v793_v24, %v1920_v6  ;;  %v856_v35 = vmul.f32 0.015625, %v777_v23  ;;  %v788_v57 = vsub.f32 %v784_v7, %v780_v36  ;;  %v917_v62 = vmul.f32 0.015625, %v780_v36 }
 0x257   : > { %v769_v38 = vpop.xlane.xlu1 %768  ;;  %v760_v19 = vpop.xlane.xlu0 %759  ;;  %v868_v44 = vsel %vm800_vm2, %v862_v52, 0.0 }
 0x258   : > { %v802_v41 = vsel %vm800_vm2, %v797_v33, 0.0  ;;  %v860_v42 = vmul.f32 %v856_v35, %v1920_v6  ;;  %v782_v58 = vsub.f32 %v760_v19, %v720_v63  ;;  %v979_v15 = vmul.f32 0.015625, %v788_v57 }
 0x259   : > { %v803_v46 = vadd.f32 %v802_v41, %v801_v60  ;;  %v785_v45 = vsub.f32 %v769_v38, %v1901_v51  ;;  %v921_v63 = vmul.f32 %v917_v62, %v1908_v10  ;;  %v703_v62 = vld [vmem:[%s2078_s2 + $0x18] sm:$0xff] }
 0x25a   : > { %v864_v11 = vsel %vm800_vm2, %v860_v42, 0.0  ;;  %v919_v18 = vmul.f32 0.015625, %v782_v58 }
 0x25b   : > { %v805_v40 = vadd.f32 %v804_v48, %v803_v46  ;;  %v865_v56 = vadd.f32 %v864_v11, %v863_v47  ;;  %v772_v20 = vpop.xlane.xlu1 %771  ;;  %v763_v28 = vpop.xlane.xlu0 %762  ;;  %v925_v38 = vsel %vm800_vm2, %v921_v63, 0.0 }
 0x25c   : > { %v786_v59 = vsub.f32 %v772_v20, %v740_v22  ;;  %v783_v53 = vsub.f32 %v763_v28, %v723_v0  ;;  %v983_v0 = vmul.f32 %v979_v15, %v1908_v10  ;;  %v923_v60 = vmul.f32 %v919_v18, %v1915_v16 }
 0x25d   : > { %v807_v26 = vadd.f32 %v806_v9, %v805_v40  ;;  %v867_v61 = vadd.f32 %v866_v50, %v865_v56  ;;  %v701_v50 = vld [vmem:[%s2078_s2 + $0x8] sm:$0xff] }
 0x25e   : > { %v790_v17 = vsub.f32 %v786_v59, %v782_v58  ;;  %v920_v22 = vmul.f32 0.015625, %v783_v53  ;;  %v987_v52 = vsel %vm800_vm2, %v983_v0, 0.0  ;;  %v700_v58 = vld [vmem:[%s2078_s2] sm:$0xff] }
 0x25f   : > { %v808_v13 = vrot.slane %v807_v26, 4  ;;  %v869_v14 = vadd.f32 %v868_v44, %v867_v61  ;;  %v757_v55 = vpop.xlane.xlu1 %756 }
 0x260   : > { %v781_v21 = vsub.f32 %v757_v55, %v717_v39  ;;  %v981_v24 = vmul.f32 0.015625, %v790_v17  ;;  %v924_v19 = vmul.f32 %v920_v22, %v1927_v30 }
 0x261   : > { %v809_v49 = vadd.f32 %v808_v13, %v807_v26  ;;  %v870_v23 = vrot.slane %v869_v14, 4 }
 0x262   : > { %v789_v29 = vsub.f32 %v785_v45, %v781_v21  ;;  %v918_v31 = vmul.f32 0.015625, %v781_v21  ;;  %v985_v41 = vmul.f32 %v981_v24, %v1915_v16  ;;  %v930_v9 = vsel %vm800_vm2, %v924_v19, 0.0 }
 0x263   : > { %v775_v37 = vpop.xlane.xlu1 %774  ;;  %v810_v33 = vrot.slane %v809_v49, 2  ;;  %v871_v35 = vadd.f32 %v870_v23, %v869_v14 }
 0x264   : > { %v922_v36 = vmul.f32 %v918_v31, %v1920_v6  ;;  %v980_v51 = vmul.f32 0.015625, %v789_v29  ;;  %v787_v39 = vsub.f32 %v775_v37, %v1903_v1  ;;  %v928_v1 = vsel %vm800_vm2, %v923_v60, 0.0 }
 0x265   : > { %v811_v8 = vadd.f32 %v810_v33, %v809_v49  ;;  %v872_v25 = vrot.slane %v871_v35, 2  ;;  %v990_v16 = vsel %vm800_vm2, %v985_v41, 0.0 }
 0x266   : > { %v926_v10 = vsel %vm800_vm2, %v922_v36, 0.0  ;;  %v984_v42 = vmul.f32 %v980_v51, %v1920_v6  ;;  %v791_v7 = vsub.f32 %v787_v39, %v783_v53  ;;  %v702_v53 = vld [vmem:[%s2078_s2 + $0x10] sm:$0xff] }
 0x267   : > { %v927_v46 = vadd.f32 %v926_v10, %v925_v38  ;;  %v812_v47 = vrot.slane %v811_v8, 1  ;;  %v873_v48 = vadd.f32 %v872_v25, %v871_v35 }
 0x268   : > { %v988_v11 = vsel %vm800_vm2, %v984_v42, 0.0  ;;  %v982_v40 = vmul.f32 0.015625, %v791_v7 }
 0x269   : > { %v929_v56 = vadd.f32 %v928_v1, %v927_v46  ;;  %v989_v57 = vadd.f32 %v988_v11, %v987_v52  ;;  %v813_v20 = vadd.f32 %v812_v47, %v811_v8  ;;  %v874_v28 = vrot.slane %v873_v48, 1 }
 0x26a   : > { %v986_v6 = vmul.f32 %v982_v40, %v1927_v30 }
 0x26b   : > { %v931_v59 = vadd.f32 %v930_v9, %v929_v56  ;;  %v991_v26 = vadd.f32 %v990_v16, %v989_v57  ;;  %v814_v61 = vmax.f32 %v813_v20, 0.0  ;;  %v875_v30 = vadd.f32 %v874_v28, %v873_v48 }
 0x26c   : > { %v992_v44 = vsel %vm800_vm2, %v986_v6, 0.0 }
 0x26d   : > { %v932_v17 = vrot.slane %v931_v59, 4  ;;  %v993_v13 = vadd.f32 %v992_v44, %v991_v26  ;;  %v816_v14 = vmul.f32 %v814_v61, %v701_v50  ;;  %v815_v15 = vmul.f32 %v814_v61, %v700_v58 }
 0x26e   : > { %v818_v55 = vmul.f32 %v814_v61, %v703_v62  ;;  %v817_v45 = vmul.f32 %v814_v61, %v702_v53  ;;  %v876_v18 = vmax.f32 %v875_v30, 0.0 }
 0x26f   : > { %v933_v21 = vadd.f32 %v932_v17, %v931_v59  ;;  %v994_v49 = vrot.slane %v993_v13, 4  ;;  %v822_v23 = vsel %vm800_vm2, %v816_v14, 0.0  ;;  %v819_v63 = vsel %vm800_vm2, %v815_v15, 0.0 }
 0x270   : > { %823 = vadd.xlane.f32.xlu1 %v822_v23  ;;  %820 = vadd.xlane.f32.xlu0 %v819_v63  ;;  %v828_v29 = vsel %vm800_vm2, %v818_v55, 0.0  ;;  %v825_v31 = vsel %vm800_vm2, %v817_v45, 0.0  ;;  %v878_v37 = vmul.f32 %v876_v18, %v701_v50  ;;  %v877_v33 = vmul.f32 %v876_v18, %v700_v58 }
 0x271   : > { %v995_v22 = vadd.f32 %v994_v49, %v993_v13  ;;  %v934_v24 = vrot.slane %v933_v21, 2  ;;  %v880_v51 = vmul.f32 %v876_v18, %v703_v62  ;;  %v879_v39 = vmul.f32 %v876_v18, %v702_v53 }
 0x272   : > { %v884_v38 = vsel %vm800_vm2, %v878_v37, 0.0  ;;  %v881_v19 = vsel %vm800_vm2, %v877_v33, 0.0 }
 0x273   : > { %v996_v0 = vrot.slane %v995_v22, 2  ;;  %v935_v35 = vadd.f32 %v934_v24, %v933_v21  ;;  %v890_v10 = vsel %vm800_vm2, %v880_v51, 0.0  ;;  %v887_v42 = vsel %vm800_vm2, %v879_v39, 0.0 }
 0x274   : > { %829 = vadd.xlane.f32.xlu1 %v828_v29  ;;  %826 = vadd.xlane.f32.xlu0 %v825_v31 }
 0x275   : > { %v997_v60 = vadd.f32 %v996_v0, %v995_v22  ;;  %v936_v36 = vrot.slane %v935_v35, 1 }
 0x277   : > { %v937_v8 = vadd.f32 %v936_v36, %v935_v35  ;;  %v998_v25 = vrot.slane %v997_v60, 1 }
 0x278   : > { %885 = vadd.xlane.f32.xlu1 %v884_v38  ;;  %882 = vadd.xlane.f32.xlu0 %v881_v19 }
 0x279   : > { %v938_v41 = vmax.f32 %v937_v8, 0.0  ;;  %v999_v47 = vadd.f32 %v998_v25, %v997_v60 }
 0x27b   : > { %v940_v7 = vmul.f32 %v938_v41, %v701_v50  ;;  %v939_v46 = vmul.f32 %v938_v41, %v700_v58  ;;  %v942_v48 = vmul.f32 %v938_v41, %v703_v62  ;;  %v941_v11 = vmul.f32 %v938_v41, %v702_v53 }
 0x27c   : > { %891 = vadd.xlane.f32.xlu1 %v890_v10  ;;  %888 = vadd.xlane.f32.xlu0 %v887_v42  ;;  %v1000_v40 = vmax.f32 %v999_v47, 0.0 }
 0x27d   : > { %v946_v52 = vsel %vm800_vm2, %v940_v7, 0.0  ;;  %v943_v1 = vsel %vm800_vm2, %v939_v46, 0.0  ;;  %v952_v56 = vsel %vm800_vm2, %v942_v48, 0.0  ;;  %v949_v57 = vsel %vm800_vm2, %v941_v11, 0.0 }
 0x27e   : > { %v1002_v20 = vmul.f32 %v1000_v40, %v701_v50  ;;  %v1001_v28 = vmul.f32 %v1000_v40, %v700_v58  ;;  %v1004_v6 = vmul.f32 %v1000_v40, %v703_v62  ;;  %v1003_v59 = vmul.f32 %v1000_v40, %v702_v53 }
 0x280   : > { %947 = vadd.xlane.f32.xlu1 %v946_v52  ;;  %944 = vadd.xlane.f32.xlu0 %v943_v1  ;;  %v1008_v16 = vsel %vm800_vm2, %v1002_v20, 0.0  ;;  %v1005_v9 = vsel %vm800_vm2, %v1001_v28, 0.0  ;;  %v1014_v26 = vsel %vm800_vm2, %v1004_v6, 0.0  ;;  %v1011_v61 = vsel %vm800_vm2, %v1003_v59, 0.0 }
 0x284   : > { %953 = vadd.xlane.f32.xlu1 %v952_v56  ;;  %950 = vadd.xlane.f32.xlu0 %v949_v57 }
 0x288   : > { %1009 = vadd.xlane.f32.xlu1 %v1008_v16  ;;  %1006 = vadd.xlane.f32.xlu0 %v1005_v9 }
 0x28c   : > { %1015 = vadd.xlane.f32.xlu1 %v1014_v26  ;;  %1012 = vadd.xlane.f32.xlu0 %v1011_v61 }
 0x2fd   : > { %v824_v30 = vpop.xlane.xlu1 %823  ;;  %v821_v44 = vpop.xlane.xlu0 %820 }
 0x2fe   : > { %v1186_v50 = vmul.f32 -1.442695, %v824_v30  ;;  %v1185_v58 = vmul.f32 -1.442695, %v821_v44 }
 0x300   : > { %1322 = vpow2.f32 %v1186_v50 }
 0x301   : > { %1324 = vpow2.f32 %v1185_v58  ;;  %v830_v17 = vpop.xlane.xlu1 %829  ;;  %v827_v13 = vpop.xlane.xlu0 %826 }
 0x302   : > { %v1188_v14 = vmul.f32 -1.442695, %v830_v17  ;;  %v1187_v15 = vmul.f32 -1.442695, %v827_v13 }
 0x304   : > { %1326 = vpow2.f32 %v1188_v14 }
 0x305   : > { %v886_v62 = vpop.xlane.xlu1 %885  ;;  %v883_v53 = vpop.xlane.xlu0 %882 }
 0x306   : > { %v1190_v55 = vmul.f32 -1.442695, %v886_v62  ;;  %v1189_v45 = vmul.f32 -1.442695, %v883_v53 }
 0x308   : > { %1328 = vpow2.f32 %v1190_v55 }
 0x309   : > { %1330 = vpow2.f32 %v1189_v45  ;;  %v892_v18 = vpop.xlane.xlu1 %891  ;;  %v889_v21 = vpop.xlane.xlu0 %888 }
 0x30a   : > { %v1323_v49 = vpop.eup %1322  ;;  %1332 = vpow2.f32 %v1187_v15  ;;  %v1192_v23 = vmul.f32 -1.442695, %v892_v18  ;;  %v1191_v24 = vmul.f32 -1.442695, %v889_v21 }
 0x30b   : > { %v1325_v63 = vpop.eup %1324  ;;  %v844_v22 = vadd.f32 1.0, %v1323_v49 }
 0x30c   : > { %v843_v29 = vadd.f32 1.0, %v1325_v63  ;;  %1334 = vpow2.f32 %v1192_v23 }
 0x30d   : > { %v948_v31 = vpop.xlane.xlu1 %947  ;;  %v945_v0 = vpop.xlane.xlu0 %944  ;;  %1336 = vrcp.f32 %v844_v22 }
 0x30e   : > { %v1327_v37 = vpop.eup %1326  ;;  %v1194_v33 = vmul.f32 -1.442695, %v948_v31  ;;  %1338 = vpow2.f32 %v1191_v24  ;;  %v1193_v60 = vmul.f32 -1.442695, %v945_v0 }
 0x30f   : > { %v846_v35 = vadd.f32 1.0, %v1327_v37  ;;  %1340 = vrcp.f32 %v843_v29 }
 0x310   : > { %1342 = vpow2.f32 %v1194_v33 }
 0x311   : > { %v954_v36 = vpop.xlane.xlu1 %953  ;;  %v951_v51 = vpop.xlane.xlu0 %950  ;;  %1344 = vrcp.f32 %v846_v35 }
 0x312   : > { %v1329_v39 = vpop.eup %1328  ;;  %v1196_v38 = vmul.f32 -1.442695, %v954_v36  ;;  %1346 = vpow2.f32 %v1193_v60  ;;  %v1195_v25 = vmul.f32 -1.442695, %v951_v51 }
 0x313   : > { %v1331_v19 = vpop.eup %1330  ;;  %v906_v8 = vadd.f32 1.0, %v1329_v39 }
 0x314   : > { %v1333_v41 = vpop.eup %1332  ;;  %v905_v10 = vadd.f32 1.0, %v1331_v19  ;;  %1348 = vpow2.f32 %v1196_v38 }
 0x315   : > { %1350 = vrcp.f32 %v906_v8  ;;  %v1010_v42 = vpop.xlane.xlu1 %1009  ;;  %v1007_v7 = vpop.xlane.xlu0 %1006  ;;  %v845_v52 = vadd.f32 1.0, %v1333_v41 }
 0x316   : > { %v1335_v46 = vpop.eup %1334  ;;  %1352 = vrcp.f32 %v905_v10  ;;  %v1198_v47 = vmul.f32 -1.442695, %v1010_v42  ;;  %v1197_v48 = vmul.f32 -1.442695, %v1007_v7 }
 0x317   : > { %v908_v1 = vadd.f32 1.0, %v1335_v46  ;;  %1354 = vpow2.f32 %v1195_v25  ;;  %v1337_v11 = vpop.eup %1336 }
 0x318   : > { %1356 = vpow2.f32 %v1198_v47  ;;  %v1339_v40 = vpop.eup %1338 }
 0x319   : > { %1358 = vrcp.f32 %v908_v1  ;;  %v1016_v56 = vpop.xlane.xlu1 %1015  ;;  %v1013_v57 = vpop.xlane.xlu0 %1012  ;;  %v907_v28 = vadd.f32 1.0, %v1339_v40 }
 0x31a   : > { %v1341_v20 = vpop.eup %1340  ;;  %1360 = vpow2.f32 %v1197_v48  ;;  %v1200_v16 = vmul.f32 -1.442695, %v1016_v56  ;;  %v1199_v6 = vmul.f32 -1.442695, %v1013_v57 }
 0x31b   : > { %v1343_v9 = vpop.eup %1342  ;;  %1362 = vrcp.f32 %v845_v52 }
 0x31c   : > { %v1345_v59 = vpop.eup %1344  ;;  %1364 = vrcp.f32 %v907_v28  ;;  %v968_v58 = vadd.f32 1.0, %v1343_v9 }
 0x31d   : > { %v1347_v26 = vpop.eup %1346  ;;  %1366 = vpow2.f32 %v1200_v16 }
 0x31e   : > { %v1349_v61 = vpop.eup %1348  ;;  %1368 = vpow2.f32 %v1199_v6  ;;  %v967_v15 = vadd.f32 1.0, %v1347_v26 }
 0x31f   : > { %v1351_v30 = vpop.eup %1350  ;;  %1370 = vrcp.f32 %v968_v58  ;;  %v970_v49 = vadd.f32 1.0, %v1349_v61 }
 0x320   : > { %v1353_v44 = vpop.eup %1352  ;;  %v1043_v50 = vsel %vm1634_vm0, %v1337_v11, %v1351_v30 }
 0x321   : > { %v1355_v17 = vpop.eup %1354  ;;  %v1067_v13 = vmul.f32 %v1043_v50, %v1858_v3  ;;  %v1041_v14 = vsel %vm1634_vm0, %v1341_v20, %v1353_v44 }
 0x322   : > { %v1357_v62 = vpop.eup %1356  ;;  %v1065_v53 = vmul.f32 %v1041_v14, %v1836_v2  ;;  %v969_v22 = vadd.f32 1.0, %v1355_v17 }
 0x323   : > { %v1359_v55 = vpop.eup %1358  ;;  %1075 = vst [vmem:[%s1997_s9 + $0x10] sm:$0xff] %v1067_v13  ;;  %v1030_v45 = vadd.f32 1.0, %v1357_v62 }
 0x324   : > { %v1361_v18 = vpop.eup %1360  ;;  %1073 = vst [vmem:[%s1997_s9] sm:$0xff] %v1065_v53  ;;  %v1047_v3 = vsel %vm1634_vm0, %v1345_v59, %v1359_v55 }
 0x325   : > { %v1363_v21 = vpop.eup %1362  ;;  %v1071_v2 = vmul.f32 %v1047_v3, %v1852_v34  ;;  %1372 = vrcp.f32 %v1030_v45  ;;  %v1029_v23 = vadd.f32 1.0, %v1361_v18 }
 0x326   : > { %v1365_v63 = vpop.eup %1364  ;;  %1374 = vrcp.f32 %v967_v15 }
 0x327   : > { %1079 = vst [vmem:[%s1997_s9 + $0x30] sm:$0xff] %v1071_v2  ;;  %v1045_v24 = vsel %vm1634_vm0, %v1363_v21, %v1365_v63  ;;  %1376 = vrcp.f32 %v1029_v23  ;;  %v1367_v29 = vpop.eup %1366 }
 0x328   : > { %v1069_v31 = vmul.f32 %v1045_v24, %v1849_v32  ;;  %v1369_v0 = vpop.eup %1368  ;;  %1378 = vrcp.f32 %v970_v49  ;;  %v1032_v37 = vadd.f32 1.0, %v1367_v29 }
 0x329   : > { %1380 = vrcp.f32 %v969_v22  ;;  %v1031_v34 = vadd.f32 1.0, %v1369_v0  ;;  %v1371_v33 = vpop.eup %1370 }
 0x32a   : > { %1077 = vst [vmem:[%s1997_s9 + $0x20] sm:$0xff] %v1069_v31  ;;  %1382 = vrcp.f32 %v1032_v37 }
 0x32b   : > { %1384 = vrcp.f32 %v1031_v34 }
 0x32f   : > { %v1373_v35 = vpop.eup %1372 }
 0x330   : > { %v1375_v4 = vpop.eup %1374  ;;  %v1052_v60 = vsel %vm1657_vm1, %v1371_v33, %v1373_v35 }
 0x331   : > { %v1377_v36 = vpop.eup %1376  ;;  %v1068_v32 = vmul.f32 %v1052_v60, %v1881_v54 }
 0x332   : > { %v1050_v51 = vsel %vm1657_vm1, %v1375_v4, %v1377_v36  ;;  %v1379_v39 = vpop.eup %1378 }
 0x333   : > { %1076 = vst [vmem:[%s1997_s9 + $0x18] sm:$0xff] %v1068_v32  ;;  %v1066_v38 = vmul.f32 %v1050_v51, %v1866_v43  ;;  %v1381_v19 = vpop.eup %1380 }
 0x334   : > { %v1383_v8 = vpop.eup %1382 }
 0x335   : > { %1074 = vst [vmem:[%s1997_s9 + $0x8] sm:$0xff] %v1066_v38  ;;  %v1385_v25 = vpop.eup %1384  ;;  %v1056_v54 = vsel %vm1657_vm1, %v1379_v39, %v1383_v8 }
 0x336   : > { %v1072_v41 = vmul.f32 %v1056_v54, %v1889_v5  ;;  %v1054_v10 = vsel %vm1657_vm1, %v1381_v19, %v1385_v25 }
 0x337   : > { %v1070_v43 = vmul.f32 %v1054_v10, %v1875_v27 }
 0x338   : > { %1080 = vst [vmem:[%s1997_s9 + $0x38] sm:$0xff] %v1072_v41 }
 0x339   : > { %1078 = vst [vmem:[%s1997_s9 + $0x28] sm:$0xff] %v1070_v43 }
 0x33a   : > { %1429 = shalt.err (!%p1426_p2)
}
 0x33b   : > { %s1430_s5 = scalar_lea.hbm %s2027_s21, 1024  ;;  %s1434_s8 = scalar_lea.hbm %s2080_s4, 2048 }
 0x33c   : > { %p1431_p4 = scmp.ne.s32.totalorder %s2027_s21, %s1430_s5  ;;  %p1435_p9 = scmp.lt.u32.totalorder %s2027_s21, %s2080_s4 }
 0x33d   : > { %p1436_p1 = scmp.lt.u32.totalorder %s1434_s8, %s1430_s5  ;;  %p1438_p6 = scmp.lt.u32.totalorder %s1430_s5, %s2027_s21 }
 0x33e   : > { %p1432_p5 = pnand %p1431_p4, %p2091_p11 }
 0x33f   : > { %p1437_p3 = por %p1436_p1, %p1435_p9 }
 0x340   : > { %p1433_p7 = pneg %p1432_p5 }
 0x341   : > { %p1439_p12 = por %p1438_p6, %p1437_p3 }
 0x343   : > { %p1440_p13 = pnand %p1439_p12, %p1433_p7 }
 0x345   : > { %1443 = shalt.err (!%p1440_p13)
}
 0x346   : > { %s1488_s27 = smov 256   ;;  %s1489_s9 = smov 16  }
 0x347   : > { %1210 = dma.vmem_to_hbm [thread:$0]  (%p2091_p11), %s2029_s11, 1024, %s2027_s21, %s1082_s0, %s1488_s27, %s1488_s27, %s1489_s9  }
 0x348 PF: > { %s1110_s14 = sand.u32 1, %s1470_s17   ;;  %p2092_p8 = scmp.ne.s32.totalorder %s2085_s29, 0 }
 0x349   : > { %p2093_p10 = scmp.ge.s32.totalorder %s1482_s20, 2  ;;  %s1111_s12 = scalar_lea.sflag [#allocation5], %s1110_s14 }
 0x34b   : > { %p1217_p0 = pnand %p2093_p10, %p2092_p8 }
 0x34d   : > { %1465 = dma.done.wait (!%p1217_p0), %s1111_s12, 1024  }
 0x34e   : > { %1467 = vsyncadd (!%p1217_p0), %s1111_s12, 4294966272  ;;  %p18_p2 = scmp.ge.s32.totalorder %s1543_s22, 4   ;;  %s2094_s17 = smov %s1474_s18 }
 0x34f   : > { %s2095_s18 = smov %s1478_s19  ;;  %s2096_s19 = smov %s1555_s25 }
 0x350   : > { %s2097_s20 = smov %s1543_s22  ;;  %20 = sbr.rel (!%p18_p2) target bundleno = 7 (0x7), region = 81 }
 0x357   :  { %1116 = vsyncpa [#allocation4], 1 }
 0x358   :  { %1118 = vsyncpa [#allocation4 + $0x1], 1 }
 0x359   :  { %1119 = vsyncpa [#allocation5], 1 }
 0x35a   :  { %1121 = vsyncpa [#allocation5 + $0x1], 1 }

</bundles_post_ra>
